<compile_context>
chip_gen: v5e
topology: v5e:2x2
jax: 0.10.0
libtpu: 0.0.40
codegen_flags: <defaults>
</compile_context>

<pallas_src>
import numpy as np
import jax
import jax.numpy as jnp
from jax.experimental import pallas as pl
from jax.experimental.pallas import tpu as pltpu

KSIZE = 7
PAD = (KSIZE - 1) // 2


def _pow2_shifts(n, stride):
    """Shift schedule [stride, 2*stride, 4*stride, ...] covering n group members."""
    shifts = []
    s = 1
    while s < n:
        shifts.append(s * stride)
        s *= 2
    return shifts


def _shift_tree(arr, shifts, combine):
    """Binary-doubling segmented reduction along lanes.

    After shifts [s, 2s, 4s, ...], lane j holds `combine` over lanes
    {j, j+s, ..., j+(n-1)s}.  Zeros are shifted in at the right edge; the shift
    schedule is chosen so the lanes read afterwards are never contaminated.
    """
    rows, _ = arr.shape
    out = arr
    for s in shifts:
        shifted = jnp.concatenate(
            [out[:, s:], jnp.zeros((rows, s), out.dtype)], axis=1)
        out = combine(out, shifted)
    return out


def _make_cbam_kernel(H, W, C):
    inv_hw = 1.0 / float(H * W)
    spatial_shifts = _pow2_shifts(C, 1)   # adjacent groups of C lanes (max over C)
    channel_shifts = _pow2_shifts(W, C)   # stride-C groups, W members (pool over W)

    def mm(a, b):
        return jnp.dot(a, b, preferred_element_type=jnp.float32)

    def kernel(x_ref, w1_ref, w2t_ref, texp_ref, gavg_ref, gsel_ref,
               eexp_ref, bband_ref, sshift_ref, o_ref):
        x = x_ref[0].astype(jnp.float32)                 # (H, W*C), lane-dense

        # ---------------- channel attention ----------------
        srow = jnp.sum(x, axis=0, keepdims=True)          # (1, W*C)
        mrow = jnp.max(x, axis=0, keepdims=True)          # (1, W*C)
        # Reduce the W spatial positions of each channel (lanes c, c+C, ...);
        # lanes [0, C) of the tree output hold the per-channel results.
        avg_pool = _shift_tree(srow, channel_shifts, jnp.add)[:, :C] * inv_hw
        max_pool = _shift_tree(mrow, channel_shifts, jnp.maximum)[:, :C]

        w1 = w1_ref[...]                                   # (Cr, C)
        w2t = w2t_ref[...]                                 # (Cr, C)

        def fc(v):                                         # (1, C) -> (1, C), VPU only
            hidden = jnp.maximum(
                jnp.sum(v * w1, axis=1, keepdims=True), 0.0)     # (Cr, 1)
            return jnp.sum(hidden * w2t, axis=0, keepdims=True)  # (1, C)

        ca = jax.nn.sigmoid(fc(avg_pool) + fc(max_pool))   # (1, C)
        ca_tiled = mm(ca, texp_ref[...])                   # (1, W*C): ca repeated per w
        x1 = x * ca_tiled                                  # (H, W*C)

        # ---------------- spatial attention -----------------
        avg_c = mm(x1, gavg_ref[...])                      # (H, W): mean over C
        tree = _shift_tree(x1, spatial_shifts, jnp.maximum)
        max_c = mm(tree, gsel_ref[...])                    # (H, W): max over C

        # 7x7 SAME conv over [avg_c, max_c] via banded (dw) + shift (dh) matmuls.
        conv = jnp.zeros((H, W), jnp.float32)
        for dh in range(KSIZE):
            z = mm(avg_c, bband_ref[2 * dh]) + mm(max_c, bband_ref[2 * dh + 1])
            conv = conv + mm(sshift_ref[dh], z)
        sa = jax.nn.sigmoid(conv)                          # (H, W)

        sa_exp = mm(sa, eexp_ref[...])                     # (H, W*C): sa repeated per c
        o_ref[0] = (x1 * sa_exp).astype(o_ref.dtype)       # lane-dense store

    return kernel


def _build_constants(H, W, C, wsp):
    """Small constant 0/1 (and conv-weight) matrices used by the kernel."""
    WC = W * C
    wsp = np.asarray(wsp, np.float32)                 # (2, 7, 7): [avg, max]

    texp = np.zeros((C, WC), np.float32)              # ca (1,C) -> (1,W*C)
    gavg = np.zeros((WC, W), np.float32)              # mean over each C-group
    gsel = np.zeros((WC, W), np.float32)              # select lane w*C (group max)
    eexp = np.zeros((W, WC), np.float32)              # sa (H,W) -> (H,W*C)
    for w in range(W):
        texp[np.arange(C), w * C + np.arange(C)] = 1.0
        gavg[w * C:(w + 1) * C, w] = 1.0 / C
        gsel[w * C, w] = 1.0
        eexp[w, w * C:(w + 1) * C] = 1.0

    # bband[2*dh + ic][k, j] = wsp[ic, dh, k - j + PAD]   (SAME padding along W)
    bband = np.zeros((2 * KSIZE, W, W), np.float32)
    # sshift[dh][i, r] = 1 iff r == i + dh - PAD          (SAME padding along H)
    sshift = np.zeros((KSIZE, H, H), np.float32)
    for dh in range(KSIZE):
        for j in range(W):
            for dw in range(KSIZE):
                k = j + dw - PAD
                if 0 <= k < W:
                    bband[2 * dh + 0, k, j] = wsp[0, dh, dw]
                    bband[2 * dh + 1, k, j] = wsp[1, dh, dw]
        for i in range(H):
            r = i + dh - PAD
            if 0 <= r < H:
                sshift[dh, i, r] = 1.0
    return (jnp.asarray(texp), jnp.asarray(gavg), jnp.asarray(gsel),
            jnp.asarray(eexp), jnp.asarray(bband), jnp.asarray(sshift))


def cbam_pallas(x_nhwc, w1, w2, wsp):
    """CBAM forward.

    x_nhwc: (B, H, W, C) channels-last activations (f32 or bf16).
    w1:  (C//r, C)  - fc conv1 weight (Cr, C, 1, 1) squeezed.
    w2:  (C, C//r)  - fc conv2 weight (C, Cr, 1, 1) squeezed.
    wsp: (2, 7, 7)  - spatial conv weight (1, 2, 7, 7) squeezed; [avg, max] order.
    """
    B, H, W, C = x_nhwc.shape
    Cr = w1.shape[0]
    WC = W * C
    assert Cr >= 1
    assert C & (C - 1) == 0 and W & (W - 1) == 0, "C and W must be powers of two"
    assert WC % 128 == 0, "W*C must be a multiple of 128 (lane-dense layout)"

    w1f = jnp.asarray(w1, jnp.float32)                 # (Cr, C)
    w2t = jnp.asarray(w2, jnp.float32).T               # (Cr, C)
    texp, gavg, gsel, eexp, bband, sshift = _build_constants(H, W, C, wsp)

    x_flat = x_nhwc.reshape(B, H, WC)                  # free: folds contiguous dims
    kernel = _make_cbam_kernel(H, W, C)

    out = pl.pallas_call(
        kernel,
        out_shape=jax.ShapeDtypeStruct((B, H, WC), x_nhwc.dtype),
        grid_spec=pltpu.PrefetchScalarGridSpec(
            num_scalar_prefetch=0,
            grid=(B,),
            in_specs=[
                pl.BlockSpec((1, H, WC), lambda b: (b, 0, 0)),         # x
                pl.BlockSpec((Cr, C), lambda b: (0, 0)),               # w1
                pl.BlockSpec((Cr, C), lambda b: (0, 0)),               # w2^T
                pl.BlockSpec((C, WC), lambda b: (0, 0)),               # texp
                pl.BlockSpec((WC, W), lambda b: (0, 0)),               # gavg
                pl.BlockSpec((WC, W), lambda b: (0, 0)),               # gsel
                pl.BlockSpec((W, WC), lambda b: (0, 0)),               # eexp
                pl.BlockSpec((2 * KSIZE, W, W), lambda b: (0, 0, 0)),  # bband
                pl.BlockSpec((KSIZE, H, H), lambda b: (0, 0, 0)),      # sshift
            ],
            out_specs=pl.BlockSpec((1, H, WC), lambda b: (b, 0, 0)),
        ),
        compiler_params=pltpu.CompilerParams(
            dimension_semantics=("parallel",),
        ),
    )(x_flat, w1f, w2t, texp, gavg, gsel, eexp, bband, sshift)
    return out.reshape(B, H, W, C)


# ----------------------- float64 numpy reference -----------------------------

def _sigmoid_np(z):
    return 1.0 / (1.0 + np.exp(-z))


def cbam_reference(x_nhwc, w1, w2, wsp):
    """float64 numpy reference of the PyTorch CBAM forward (channels-last)."""
    x = np.asarray(x_nhwc, np.float64)
    w1 = np.asarray(w1, np.float64)     # (Cr, C)
    w2 = np.asarray(w2, np.float64)     # (C, Cr)
    wsp = np.asarray(wsp, np.float64)   # (2, 7, 7)
    B, H, W, _ = x.shape

    avg = x.mean(axis=(1, 2))
    mx = x.max(axis=(1, 2))

    def fc(v):
        return np.maximum(v @ w1.T, 0.0) @ w2.T

    ca = _sigmoid_np(fc(avg) + fc(mx))
    x1 = x * ca[:, None, None, :]

    avg_c = x1.mean(axis=3)
    max_c = x1.max(axis=3)
    feat = np.stack([avg_c, max_c], axis=1)               # (B, 2, H, W)
    padded = np.pad(feat, ((0, 0), (0, 0), (PAD, PAD), (PAD, PAD)))
    conv = np.zeros((B, H, W), np.float64)
    for ic in range(2):
        for dh in range(KSIZE):
            for dw in range(KSIZE):
                conv += wsp[ic, dh, dw] * padded[:, ic, dh:dh + H, dw:dw + W]
    sa = _sigmoid_np(conv)
    return x1 * sa[:, :, :, None]


if __name__ == "__main__":
    B, C, H, W = 2, 32, 16, 16
    ratio = 16
    Cr = C // ratio   # = 2

    key = jax.random.PRNGKey(0)
    kx, k1, k2, k3 = jax.random.split(key, 4)

    # Activations are kept channels-last (NHWC) end to end; no NCHW->NHWC HBM
    # transpose is ever issued.
    x = jax.random.normal(kx, (B, H, W, C), dtype=jnp.float32)

    # Parameter shapes follow the nn.Module (bias-free 1x1 / 7x7 convs).
    w1 = 0.1 * jax.random.normal(k1, (Cr, C), dtype=jnp.float32)
    w2 = 0.1 * jax.random.normal(k2, (C, Cr), dtype=jnp.float32)
    wsp = 0.1 * jax.random.normal(k3, (2, KSIZE, KSIZE), dtype=jnp.float32)

    out = jax.block_until_ready(cbam_pallas(x, w1, w2, wsp))

    ref = cbam_reference(x, w1, w2, wsp)
    # Tolerance is loose enough to cover bf16-pass MXU matmuls (selector/conv
    # matrices); the result is typically far more accurate than this.
    np.testing.assert_allclose(np.asarray(out, np.float64), ref,
                               rtol=2e-2, atol=2e-2)

    print("KERNEL_OK")
</pallas_src>

<mosaic_0001>
module attributes {stable_mosaic.version = 11 : i64} {
  func.func @kernel(%arg0: i32, %arg1: memref<1x16x512xf32, #tpu.memory_space<vmem>>, %arg2: memref<2x32xf32, #tpu.memory_space<vmem>>, %arg3: memref<2x32xf32, #tpu.memory_space<vmem>>, %arg4: memref<32x512xf32, #tpu.memory_space<vmem>>, %arg5: memref<512x16xf32, #tpu.memory_space<vmem>>, %arg6: memref<512x16xf32, #tpu.memory_space<vmem>>, %arg7: memref<16x512xf32, #tpu.memory_space<vmem>>, %arg8: memref<14x16x16xf32, #tpu.memory_space<vmem>>, %arg9: memref<7x16x16xf32, #tpu.memory_space<vmem>>, %arg10: memref<1x16x512xf32, #tpu.memory_space<vmem>>) attributes {dimension_semantics = [#tpu.dimension_semantics<parallel>], iteration_bounds = array<i64: 2>, scalar_prefetch = 0 : i64, scratch_operands = 0 : i64, tpu.core_type = #tpu.core_type<tc>, window_params = [{transform_indices = @transform_0, window_bounds = array<i64: 1, 16, 512>}, {pipeline_mode = #tpu.pipeline_mode<synchronous>, transform_indices = @transform_1, window_bounds = array<i64: 2, 32>}, {pipeline_mode = #tpu.pipeline_mode<synchronous>, transform_indices = @transform_2, window_bounds = array<i64: 2, 32>}, {pipeline_mode = #tpu.pipeline_mode<synchronous>, transform_indices = @transform_3, window_bounds = array<i64: 32, 512>}, {pipeline_mode = #tpu.pipeline_mode<synchronous>, transform_indices = @transform_4, window_bounds = array<i64: 512, 16>}, {pipeline_mode = #tpu.pipeline_mode<synchronous>, transform_indices = @transform_5, window_bounds = array<i64: 512, 16>}, {pipeline_mode = #tpu.pipeline_mode<synchronous>, transform_indices = @transform_6, window_bounds = array<i64: 16, 512>}, {pipeline_mode = #tpu.pipeline_mode<synchronous>, transform_indices = @transform_7, window_bounds = array<i64: 14, 16, 16>}, {pipeline_mode = #tpu.pipeline_mode<synchronous>, transform_indices = @transform_8, window_bounds = array<i64: 7, 16, 16>}, {transform_indices = @transform_9, window_bounds = array<i64: 1, 16, 512>}]} {
    %c0 = arith.constant 0 : index
    %c0_0 = arith.constant 0 : index
    %c0_1 = arith.constant 0 : index
    %0 = vector.load %arg1[%c0, %c0_0, %c0_1] : memref<1x16x512xf32, #tpu.memory_space<vmem>>, vector<1x16x512xf32>
    %1 = vector.shape_cast %0 : vector<1x16x512xf32> to vector<16x512xf32>
    %cst = arith.constant dense<0.000000e+00> : vector<512xf32>
    %2 = vector.multi_reduction <add>, %1, %cst [0] : vector<16x512xf32> to vector<512xf32>
    %3 = vector.shape_cast %2 : vector<512xf32> to vector<1x512xf32>
    %cst_2 = arith.constant dense<0xFF800000> : vector<512xf32>
    %4 = vector.multi_reduction <maximumf>, %1, %cst_2 [0] : vector<16x512xf32> to vector<512xf32>
    %5 = vector.shape_cast %4 : vector<512xf32> to vector<1x512xf32>
    %6 = vector.extract_strided_slice %3 {offsets = [0, 32], sizes = [1, 480], strides = [1, 1]} : vector<1x512xf32> to vector<1x480xf32>
    %cst_3 = arith.constant 0.000000e+00 : f32
    %7 = vector.broadcast %cst_3 : f32 to vector<1x32xf32>
    %8 = tpu.concatenate %6, %7 in 1 : vector<1x480xf32>, vector<1x32xf32> -> vector<1x512xf32>
    %9 = arith.addf %3, %8 : vector<1x512xf32>
    %10 = vector.extract_strided_slice %9 {offsets = [0, 64], sizes = [1, 448], strides = [1, 1]} : vector<1x512xf32> to vector<1x448xf32>
    %cst_4 = arith.constant 0.000000e+00 : f32
    %11 = vector.broadcast %cst_4 : f32 to vector<1x64xf32>
    %12 = tpu.concatenate %10, %11 in 1 : vector<1x448xf32>, vector<1x64xf32> -> vector<1x512xf32>
    %13 = arith.addf %9, %12 : vector<1x512xf32>
    %14 = vector.extract_strided_slice %13 {offsets = [0, 128], sizes = [1, 384], strides = [1, 1]} : vector<1x512xf32> to vector<1x384xf32>
    %cst_5 = arith.constant 0.000000e+00 : f32
    %15 = vector.broadcast %cst_5 : f32 to vector<1x128xf32>
    %16 = tpu.concatenate %14, %15 in 1 : vector<1x384xf32>, vector<1x128xf32> -> vector<1x512xf32>
    %17 = arith.addf %13, %16 : vector<1x512xf32>
    %18 = vector.extract_strided_slice %17 {offsets = [0, 256], sizes = [1, 256], strides = [1, 1]} : vector<1x512xf32> to vector<1x256xf32>
    %cst_6 = arith.constant 0.000000e+00 : f32
    %19 = vector.broadcast %cst_6 : f32 to vector<1x256xf32>
    %20 = tpu.concatenate %18, %19 in 1 : vector<1x256xf32>, vector<1x256xf32> -> vector<1x512xf32>
    %21 = arith.addf %17, %20 : vector<1x512xf32>
    %22 = vector.extract_strided_slice %21 {offsets = [0, 0], sizes = [1, 32], strides = [1, 1]} : vector<1x512xf32> to vector<1x32xf32>
    %cst_7 = arith.constant 3.906250e-03 : f32
    %23 = vector.broadcast %cst_7 : f32 to vector<1x32xf32>
    %24 = arith.mulf %22, %23 : vector<1x32xf32>
    %25 = vector.extract_strided_slice %5 {offsets = [0, 32], sizes = [1, 480], strides = [1, 1]} : vector<1x512xf32> to vector<1x480xf32>
    %cst_8 = arith.constant 0.000000e+00 : f32
    %26 = vector.broadcast %cst_8 : f32 to vector<1x32xf32>
    %27 = tpu.concatenate %25, %26 in 1 : vector<1x480xf32>, vector<1x32xf32> -> vector<1x512xf32>
    %28 = arith.maximumf %5, %27 : vector<1x512xf32>
    %29 = vector.extract_strided_slice %28 {offsets = [0, 64], sizes = [1, 448], strides = [1, 1]} : vector<1x512xf32> to vector<1x448xf32>
    %cst_9 = arith.constant 0.000000e+00 : f32
    %30 = vector.broadcast %cst_9 : f32 to vector<1x64xf32>
    %31 = tpu.concatenate %29, %30 in 1 : vector<1x448xf32>, vector<1x64xf32> -> vector<1x512xf32>
    %32 = arith.maximumf %28, %31 : vector<1x512xf32>
    %33 = vector.extract_strided_slice %32 {offsets = [0, 128], sizes = [1, 384], strides = [1, 1]} : vector<1x512xf32> to vector<1x384xf32>
    %cst_10 = arith.constant 0.000000e+00 : f32
    %34 = vector.broadcast %cst_10 : f32 to vector<1x128xf32>
    %35 = tpu.concatenate %33, %34 in 1 : vector<1x384xf32>, vector<1x128xf32> -> vector<1x512xf32>
    %36 = arith.maximumf %32, %35 : vector<1x512xf32>
    %37 = vector.extract_strided_slice %36 {offsets = [0, 256], sizes = [1, 256], strides = [1, 1]} : vector<1x512xf32> to vector<1x256xf32>
    %cst_11 = arith.constant 0.000000e+00 : f32
    %38 = vector.broadcast %cst_11 : f32 to vector<1x256xf32>
    %39 = tpu.concatenate %37, %38 in 1 : vector<1x256xf32>, vector<1x256xf32> -> vector<1x512xf32>
    %40 = arith.maximumf %36, %39 : vector<1x512xf32>
    %41 = vector.extract_strided_slice %40 {offsets = [0, 0], sizes = [1, 32], strides = [1, 1]} : vector<1x512xf32> to vector<1x32xf32>
    %c0_12 = arith.constant 0 : index
    %c0_13 = arith.constant 0 : index
    %42 = vector.load %arg2[%c0_12, %c0_13] : memref<2x32xf32, #tpu.memory_space<vmem>>, vector<2x32xf32>
    %c0_14 = arith.constant 0 : index
    %c0_15 = arith.constant 0 : index
    %43 = vector.load %arg3[%c0_14, %c0_15] : memref<2x32xf32, #tpu.memory_space<vmem>>, vector<2x32xf32>
    %44 = vector.broadcast %24 : vector<1x32xf32> to vector<2x32xf32>
    %45 = arith.mulf %44, %42 : vector<2x32xf32>
    %cst_16 = arith.constant dense<0.000000e+00> : vector<2xf32>
    %46 = vector.multi_reduction <add>, %45, %cst_16 [1] : vector<2x32xf32> to vector<2xf32>
    %47 = vector.shape_cast %46 : vector<2xf32> to vector<2x1xf32>
    %cst_17 = arith.constant 0.000000e+00 : f32
    %48 = vector.broadcast %cst_17 : f32 to vector<2x1xf32>
    %49 = arith.maximumf %47, %48 : vector<2x1xf32>
    %50 = vector.broadcast %49 : vector<2x1xf32> to vector<2x32xf32>
    %51 = arith.mulf %50, %43 : vector<2x32xf32>
    %cst_18 = arith.constant dense<0.000000e+00> : vector<32xf32>
    %52 = vector.multi_reduction <add>, %51, %cst_18 [0] : vector<2x32xf32> to vector<32xf32>
    %53 = vector.shape_cast %52 : vector<32xf32> to vector<1x32xf32>
    %54 = vector.broadcast %41 : vector<1x32xf32> to vector<2x32xf32>
    %55 = arith.mulf %54, %42 : vector<2x32xf32>
    %cst_19 = arith.constant dense<0.000000e+00> : vector<2xf32>
    %56 = vector.multi_reduction <add>, %55, %cst_19 [1] : vector<2x32xf32> to vector<2xf32>
    %57 = vector.shape_cast %56 : vector<2xf32> to vector<2x1xf32>
    %cst_20 = arith.constant 0.000000e+00 : f32
    %58 = vector.broadcast %cst_20 : f32 to vector<2x1xf32>
    %59 = arith.maximumf %57, %58 : vector<2x1xf32>
    %60 = vector.broadcast %59 : vector<2x1xf32> to vector<2x32xf32>
    %61 = arith.mulf %60, %43 : vector<2x32xf32>
    %cst_21 = arith.constant dense<0.000000e+00> : vector<32xf32>
    %62 = vector.multi_reduction <add>, %61, %cst_21 [0] : vector<2x32xf32> to vector<32xf32>
    %63 = vector.shape_cast %62 : vector<32xf32> to vector<1x32xf32>
    %64 = arith.addf %53, %63 : vector<1x32xf32>
    %65 = arith.negf %64 : vector<1x32xf32>
    %66 = math.exp %65 : vector<1x32xf32>
    %cst_22 = arith.constant 1.000000e+00 : f32
    %67 = vector.broadcast %cst_22 : f32 to vector<1x32xf32>
    %68 = arith.addf %67, %66 : vector<1x32xf32>
    %69 = arith.divf %67, %68 : vector<1x32xf32>
    %c0_23 = arith.constant 0 : index
    %c0_24 = arith.constant 0 : index
    %70 = vector.load %arg4[%c0_23, %c0_24] : memref<32x512xf32, #tpu.memory_space<vmem>>, vector<32x512xf32>
    %cst_25 = arith.constant dense<0.000000e+00> : vector<1x512xf32>
    %71 = tpu.matmul %69, %70, %cst_25 {dimension_numbers = #tpu.dot_dimension_numbers<[1], [0], [0], [1], [0, 0, 1, 1], [], []>} : vector<1x32xf32>, vector<32x512xf32>, vector<1x512xf32> -> vector<1x512xf32>
    %72 = vector.broadcast %71 : vector<1x512xf32> to vector<16x512xf32>
    %73 = arith.mulf %1, %72 : vector<16x512xf32>
    %c0_26 = arith.constant 0 : index
    %c0_27 = arith.constant 0 : index
    %74 = vector.load %arg5[%c0_26, %c0_27] : memref<512x16xf32, #tpu.memory_space<vmem>>, vector<512x16xf32>
    %cst_28 = arith.constant dense<0.000000e+00> : vector<16x16xf32>
    %75 = tpu.matmul %73, %74, %cst_28 {dimension_numbers = #tpu.dot_dimension_numbers<[1], [0], [0], [1], [0, 0, 1, 1], [], []>} : vector<16x512xf32>, vector<512x16xf32>, vector<16x16xf32> -> vector<16x16xf32>
    %76 = vector.extract_strided_slice %73 {offsets = [0, 1], sizes = [16, 511], strides = [1, 1]} : vector<16x512xf32> to vector<16x511xf32>
    %cst_29 = arith.constant 0.000000e+00 : f32
    %77 = vector.broadcast %cst_29 : f32 to vector<16x1xf32>
    %78 = tpu.concatenate %76, %77 in 1 : vector<16x511xf32>, vector<16x1xf32> -> vector<16x512xf32>
    %79 = arith.maximumf %73, %78 : vector<16x512xf32>
    %80 = vector.extract_strided_slice %79 {offsets = [0, 2], sizes = [16, 510], strides = [1, 1]} : vector<16x512xf32> to vector<16x510xf32>
    %cst_30 = arith.constant 0.000000e+00 : f32
    %81 = vector.broadcast %cst_30 : f32 to vector<16x2xf32>
    %82 = tpu.concatenate %80, %81 in 1 : vector<16x510xf32>, vector<16x2xf32> -> vector<16x512xf32>
    %83 = arith.maximumf %79, %82 : vector<16x512xf32>
    %84 = vector.extract_strided_slice %83 {offsets = [0, 4], sizes = [16, 508], strides = [1, 1]} : vector<16x512xf32> to vector<16x508xf32>
    %cst_31 = arith.constant 0.000000e+00 : f32
    %85 = vector.broadcast %cst_31 : f32 to vector<16x4xf32>
    %86 = tpu.concatenate %84, %85 in 1 : vector<16x508xf32>, vector<16x4xf32> -> vector<16x512xf32>
    %87 = arith.maximumf %83, %86 : vector<16x512xf32>
    %88 = vector.extract_strided_slice %87 {offsets = [0, 8], sizes = [16, 504], strides = [1, 1]} : vector<16x512xf32> to vector<16x504xf32>
    %cst_32 = arith.constant 0.000000e+00 : f32
    %89 = vector.broadcast %cst_32 : f32 to vector<16x8xf32>
    %90 = tpu.concatenate %88, %89 in 1 : vector<16x504xf32>, vector<16x8xf32> -> vector<16x512xf32>
    %91 = arith.maximumf %87, %90 : vector<16x512xf32>
    %92 = vector.extract_strided_slice %91 {offsets = [0, 16], sizes = [16, 496], strides = [1, 1]} : vector<16x512xf32> to vector<16x496xf32>
    %cst_33 = arith.constant 0.000000e+00 : f32
    %93 = vector.broadcast %cst_33 : f32 to vector<16x16xf32>
    %94 = tpu.concatenate %92, %93 in 1 : vector<16x496xf32>, vector<16x16xf32> -> vector<16x512xf32>
    %95 = arith.maximumf %91, %94 : vector<16x512xf32>
    %c0_34 = arith.constant 0 : index
    %c0_35 = arith.constant 0 : index
    %96 = vector.load %arg6[%c0_34, %c0_35] : memref<512x16xf32, #tpu.memory_space<vmem>>, vector<512x16xf32>
    %cst_36 = arith.constant dense<0.000000e+00> : vector<16x16xf32>
    %97 = tpu.matmul %95, %96, %cst_36 {dimension_numbers = #tpu.dot_dimension_numbers<[1], [0], [0], [1], [0, 0, 1, 1], [], []>} : vector<16x512xf32>, vector<512x16xf32>, vector<16x16xf32> -> vector<16x16xf32>
    %cst_37 = arith.constant 0.000000e+00 : f32
    %98 = vector.broadcast %cst_37 : f32 to vector<16x16xf32>
    %c0_38 = arith.constant 0 : index
    %c0_39 = arith.constant 0 : index
    %c0_40 = arith.constant 0 : index
    %99 = vector.load %arg8[%c0_38, %c0_39, %c0_40] : memref<14x16x16xf32, #tpu.memory_space<vmem>>, vector<1x16x16xf32>
    %100 = vector.shape_cast %99 : vector<1x16x16xf32> to vector<16x16xf32>
    %cst_41 = arith.constant dense<0.000000e+00> : vector<16x16xf32>
    %101 = tpu.matmul %75, %100, %cst_41 {dimension_numbers = #tpu.dot_dimension_numbers<[1], [0], [0], [1], [0, 0, 1, 1], [], []>} : vector<16x16xf32>, vector<16x16xf32>, vector<16x16xf32> -> vector<16x16xf32>
    %c1 = arith.constant 1 : index
    %c0_42 = arith.constant 0 : index
    %c0_43 = arith.constant 0 : index
    %102 = vector.load %arg8[%c1, %c0_42, %c0_43] : memref<14x16x16xf32, #tpu.memory_space<vmem>>, vector<1x16x16xf32>
    %103 = vector.shape_cast %102 : vector<1x16x16xf32> to vector<16x16xf32>
    %cst_44 = arith.constant dense<0.000000e+00> : vector<16x16xf32>
    %104 = tpu.matmul %97, %103, %cst_44 {dimension_numbers = #tpu.dot_dimension_numbers<[1], [0], [0], [1], [0, 0, 1, 1], [], []>} : vector<16x16xf32>, vector<16x16xf32>, vector<16x16xf32> -> vector<16x16xf32>
    %105 = arith.addf %101, %104 : vector<16x16xf32>
    %c0_45 = arith.constant 0 : index
    %c0_46 = arith.constant 0 : index
    %c0_47 = arith.constant 0 : index
    %106 = vector.load %arg9[%c0_45, %c0_46, %c0_47] : memref<7x16x16xf32, #tpu.memory_space<vmem>>, vector<1x16x16xf32>
    %107 = vector.shape_cast %106 : vector<1x16x16xf32> to vector<16x16xf32>
    %cst_48 = arith.constant dense<0.000000e+00> : vector<16x16xf32>
    %108 = tpu.matmul %107, %105, %cst_48 {dimension_numbers = #tpu.dot_dimension_numbers<[1], [0], [0], [1], [0, 0, 1, 1], [], []>} : vector<16x16xf32>, vector<16x16xf32>, vector<16x16xf32> -> vector<16x16xf32>
    %109 = arith.addf %98, %108 : vector<16x16xf32>
    %c2 = arith.constant 2 : index
    %c0_49 = arith.constant 0 : index
    %c0_50 = arith.constant 0 : index
    %110 = vector.load %arg8[%c2, %c0_49, %c0_50] : memref<14x16x16xf32, #tpu.memory_space<vmem>>, vector<1x16x16xf32>
    %111 = vector.shape_cast %110 : vector<1x16x16xf32> to vector<16x16xf32>
    %cst_51 = arith.constant dense<0.000000e+00> : vector<16x16xf32>
    %112 = tpu.matmul %75, %111, %cst_51 {dimension_numbers = #tpu.dot_dimension_numbers<[1], [0], [0], [1], [0, 0, 1, 1], [], []>} : vector<16x16xf32>, vector<16x16xf32>, vector<16x16xf32> -> vector<16x16xf32>
    %c3 = arith.constant 3 : index
    %c0_52 = arith.constant 0 : index
    %c0_53 = arith.constant 0 : index
    %113 = vector.load %arg8[%c3, %c0_52, %c0_53] : memref<14x16x16xf32, #tpu.memory_space<vmem>>, vector<1x16x16xf32>
    %114 = vector.shape_cast %113 : vector<1x16x16xf32> to vector<16x16xf32>
    %cst_54 = arith.constant dense<0.000000e+00> : vector<16x16xf32>
    %115 = tpu.matmul %97, %114, %cst_54 {dimension_numbers = #tpu.dot_dimension_numbers<[1], [0], [0], [1], [0, 0, 1, 1], [], []>} : vector<16x16xf32>, vector<16x16xf32>, vector<16x16xf32> -> vector<16x16xf32>
    %116 = arith.addf %112, %115 : vector<16x16xf32>
    %c1_55 = arith.constant 1 : index
    %c0_56 = arith.constant 0 : index
    %c0_57 = arith.constant 0 : index
    %117 = vector.load %arg9[%c1_55, %c0_56, %c0_57] : memref<7x16x16xf32, #tpu.memory_space<vmem>>, vector<1x16x16xf32>
    %118 = vector.shape_cast %117 : vector<1x16x16xf32> to vector<16x16xf32>
    %cst_58 = arith.constant dense<0.000000e+00> : vector<16x16xf32>
    %119 = tpu.matmul %118, %116, %cst_58 {dimension_numbers = #tpu.dot_dimension_numbers<[1], [0], [0], [1], [0, 0, 1, 1], [], []>} : vector<16x16xf32>, vector<16x16xf32>, vector<16x16xf32> -> vector<16x16xf32>
    %120 = arith.addf %109, %119 : vector<16x16xf32>
    %c4 = arith.constant 4 : index
    %c0_59 = arith.constant 0 : index
    %c0_60 = arith.constant 0 : index
    %121 = vector.load %arg8[%c4, %c0_59, %c0_60] : memref<14x16x16xf32, #tpu.memory_space<vmem>>, vector<1x16x16xf32>
    %122 = vector.shape_cast %121 : vector<1x16x16xf32> to vector<16x16xf32>
    %cst_61 = arith.constant dense<0.000000e+00> : vector<16x16xf32>
    %123 = tpu.matmul %75, %122, %cst_61 {dimension_numbers = #tpu.dot_dimension_numbers<[1], [0], [0], [1], [0, 0, 1, 1], [], []>} : vector<16x16xf32>, vector<16x16xf32>, vector<16x16xf32> -> vector<16x16xf32>
    %c5 = arith.constant 5 : index
    %c0_62 = arith.constant 0 : index
    %c0_63 = arith.constant 0 : index
    %124 = vector.load %arg8[%c5, %c0_62, %c0_63] : memref<14x16x16xf32, #tpu.memory_space<vmem>>, vector<1x16x16xf32>
    %125 = vector.shape_cast %124 : vector<1x16x16xf32> to vector<16x16xf32>
    %cst_64 = arith.constant dense<0.000000e+00> : vector<16x16xf32>
    %126 = tpu.matmul %97, %125, %cst_64 {dimension_numbers = #tpu.dot_dimension_numbers<[1], [0], [0], [1], [0, 0, 1, 1], [], []>} : vector<16x16xf32>, vector<16x16xf32>, vector<16x16xf32> -> vector<16x16xf32>
    %127 = arith.addf %123, %126 : vector<16x16xf32>
    %c2_65 = arith.constant 2 : index
    %c0_66 = arith.constant 0 : index
    %c0_67 = arith.constant 0 : index
    %128 = vector.load %arg9[%c2_65, %c0_66, %c0_67] : memref<7x16x16xf32, #tpu.memory_space<vmem>>, vector<1x16x16xf32>
    %129 = vector.shape_cast %128 : vector<1x16x16xf32> to vector<16x16xf32>
    %cst_68 = arith.constant dense<0.000000e+00> : vector<16x16xf32>
    %130 = tpu.matmul %129, %127, %cst_68 {dimension_numbers = #tpu.dot_dimension_numbers<[1], [0], [0], [1], [0, 0, 1, 1], [], []>} : vector<16x16xf32>, vector<16x16xf32>, vector<16x16xf32> -> vector<16x16xf32>
    %131 = arith.addf %120, %130 : vector<16x16xf32>
    %c6 = arith.constant 6 : index
    %c0_69 = arith.constant 0 : index
    %c0_70 = arith.constant 0 : index
    %132 = vector.load %arg8[%c6, %c0_69, %c0_70] : memref<14x16x16xf32, #tpu.memory_space<vmem>>, vector<1x16x16xf32>
    %133 = vector.shape_cast %132 : vector<1x16x16xf32> to vector<16x16xf32>
    %cst_71 = arith.constant dense<0.000000e+00> : vector<16x16xf32>
    %134 = tpu.matmul %75, %133, %cst_71 {dimension_numbers = #tpu.dot_dimension_numbers<[1], [0], [0], [1], [0, 0, 1, 1], [], []>} : vector<16x16xf32>, vector<16x16xf32>, vector<16x16xf32> -> vector<16x16xf32>
    %c7 = arith.constant 7 : index
    %c0_72 = arith.constant 0 : index
    %c0_73 = arith.constant 0 : index
    %135 = vector.load %arg8[%c7, %c0_72, %c0_73] : memref<14x16x16xf32, #tpu.memory_space<vmem>>, vector<1x16x16xf32>
    %136 = vector.shape_cast %135 : vector<1x16x16xf32> to vector<16x16xf32>
    %cst_74 = arith.constant dense<0.000000e+00> : vector<16x16xf32>
    %137 = tpu.matmul %97, %136, %cst_74 {dimension_numbers = #tpu.dot_dimension_numbers<[1], [0], [0], [1], [0, 0, 1, 1], [], []>} : vector<16x16xf32>, vector<16x16xf32>, vector<16x16xf32> -> vector<16x16xf32>
    %138 = arith.addf %134, %137 : vector<16x16xf32>
    %c3_75 = arith.constant 3 : index
    %c0_76 = arith.constant 0 : index
    %c0_77 = arith.constant 0 : index
    %139 = vector.load %arg9[%c3_75, %c0_76, %c0_77] : memref<7x16x16xf32, #tpu.memory_space<vmem>>, vector<1x16x16xf32>
    %140 = vector.shape_cast %139 : vector<1x16x16xf32> to vector<16x16xf32>
    %cst_78 = arith.constant dense<0.000000e+00> : vector<16x16xf32>
    %141 = tpu.matmul %140, %138, %cst_78 {dimension_numbers = #tpu.dot_dimension_numbers<[1], [0], [0], [1], [0, 0, 1, 1], [], []>} : vector<16x16xf32>, vector<16x16xf32>, vector<16x16xf32> -> vector<16x16xf32>
    %142 = arith.addf %131, %141 : vector<16x16xf32>
    %c8 = arith.constant 8 : index
    %c0_79 = arith.constant 0 : index
    %c0_80 = arith.constant 0 : index
    %143 = vector.load %arg8[%c8, %c0_79, %c0_80] : memref<14x16x16xf32, #tpu.memory_space<vmem>>, vector<1x16x16xf32>
    %144 = vector.shape_cast %143 : vector<1x16x16xf32> to vector<16x16xf32>
    %cst_81 = arith.constant dense<0.000000e+00> : vector<16x16xf32>
    %145 = tpu.matmul %75, %144, %cst_81 {dimension_numbers = #tpu.dot_dimension_numbers<[1], [0], [0], [1], [0, 0, 1, 1], [], []>} : vector<16x16xf32>, vector<16x16xf32>, vector<16x16xf32> -> vector<16x16xf32>
    %c9 = arith.constant 9 : index
    %c0_82 = arith.constant 0 : index
    %c0_83 = arith.constant 0 : index
    %146 = vector.load %arg8[%c9, %c0_82, %c0_83] : memref<14x16x16xf32, #tpu.memory_space<vmem>>, vector<1x16x16xf32>
    %147 = vector.shape_cast %146 : vector<1x16x16xf32> to vector<16x16xf32>
    %cst_84 = arith.constant dense<0.000000e+00> : vector<16x16xf32>
    %148 = tpu.matmul %97, %147, %cst_84 {dimension_numbers = #tpu.dot_dimension_numbers<[1], [0], [0], [1], [0, 0, 1, 1], [], []>} : vector<16x16xf32>, vector<16x16xf32>, vector<16x16xf32> -> vector<16x16xf32>
    %149 = arith.addf %145, %148 : vector<16x16xf32>
    %c4_85 = arith.constant 4 : index
    %c0_86 = arith.constant 0 : index
    %c0_87 = arith.constant 0 : index
    %150 = vector.load %arg9[%c4_85, %c0_86, %c0_87] : memref<7x16x16xf32, #tpu.memory_space<vmem>>, vector<1x16x16xf32>
    %151 = vector.shape_cast %150 : vector<1x16x16xf32> to vector<16x16xf32>
    %cst_88 = arith.constant dense<0.000000e+00> : vector<16x16xf32>
    %152 = tpu.matmul %151, %149, %cst_88 {dimension_numbers = #tpu.dot_dimension_numbers<[1], [0], [0], [1], [0, 0, 1, 1], [], []>} : vector<16x16xf32>, vector<16x16xf32>, vector<16x16xf32> -> vector<16x16xf32>
    %153 = arith.addf %142, %152 : vector<16x16xf32>
    %c10 = arith.constant 10 : index
    %c0_89 = arith.constant 0 : index
    %c0_90 = arith.constant 0 : index
    %154 = vector.load %arg8[%c10, %c0_89, %c0_90] : memref<14x16x16xf32, #tpu.memory_space<vmem>>, vector<1x16x16xf32>
    %155 = vector.shape_cast %154 : vector<1x16x16xf32> to vector<16x16xf32>
    %cst_91 = arith.constant dense<0.000000e+00> : vector<16x16xf32>
    %156 = tpu.matmul %75, %155, %cst_91 {dimension_numbers = #tpu.dot_dimension_numbers<[1], [0], [0], [1], [0, 0, 1, 1], [], []>} : vector<16x16xf32>, vector<16x16xf32>, vector<16x16xf32> -> vector<16x16xf32>
    %c11 = arith.constant 11 : index
    %c0_92 = arith.constant 0 : index
    %c0_93 = arith.constant 0 : index
    %157 = vector.load %arg8[%c11, %c0_92, %c0_93] : memref<14x16x16xf32, #tpu.memory_space<vmem>>, vector<1x16x16xf32>
    %158 = vector.shape_cast %157 : vector<1x16x16xf32> to vector<16x16xf32>
    %cst_94 = arith.constant dense<0.000000e+00> : vector<16x16xf32>
    %159 = tpu.matmul %97, %158, %cst_94 {dimension_numbers = #tpu.dot_dimension_numbers<[1], [0], [0], [1], [0, 0, 1, 1], [], []>} : vector<16x16xf32>, vector<16x16xf32>, vector<16x16xf32> -> vector<16x16xf32>
    %160 = arith.addf %156, %159 : vector<16x16xf32>
    %c5_95 = arith.constant 5 : index
    %c0_96 = arith.constant 0 : index
    %c0_97 = arith.constant 0 : index
    %161 = vector.load %arg9[%c5_95, %c0_96, %c0_97] : memref<7x16x16xf32, #tpu.memory_space<vmem>>, vector<1x16x16xf32>
    %162 = vector.shape_cast %161 : vector<1x16x16xf32> to vector<16x16xf32>
    %cst_98 = arith.constant dense<0.000000e+00> : vector<16x16xf32>
    %163 = tpu.matmul %162, %160, %cst_98 {dimension_numbers = #tpu.dot_dimension_numbers<[1], [0], [0], [1], [0, 0, 1, 1], [], []>} : vector<16x16xf32>, vector<16x16xf32>, vector<16x16xf32> -> vector<16x16xf32>
    %164 = arith.addf %153, %163 : vector<16x16xf32>
    %c12 = arith.constant 12 : index
    %c0_99 = arith.constant 0 : index
    %c0_100 = arith.constant 0 : index
    %165 = vector.load %arg8[%c12, %c0_99, %c0_100] : memref<14x16x16xf32, #tpu.memory_space<vmem>>, vector<1x16x16xf32>
    %166 = vector.shape_cast %165 : vector<1x16x16xf32> to vector<16x16xf32>
    %cst_101 = arith.constant dense<0.000000e+00> : vector<16x16xf32>
    %167 = tpu.matmul %75, %166, %cst_101 {dimension_numbers = #tpu.dot_dimension_numbers<[1], [0], [0], [1], [0, 0, 1, 1], [], []>} : vector<16x16xf32>, vector<16x16xf32>, vector<16x16xf32> -> vector<16x16xf32>
    %c13 = arith.constant 13 : index
    %c0_102 = arith.constant 0 : index
    %c0_103 = arith.constant 0 : index
    %168 = vector.load %arg8[%c13, %c0_102, %c0_103] : memref<14x16x16xf32, #tpu.memory_space<vmem>>, vector<1x16x16xf32>
    %169 = vector.shape_cast %168 : vector<1x16x16xf32> to vector<16x16xf32>
    %cst_104 = arith.constant dense<0.000000e+00> : vector<16x16xf32>
    %170 = tpu.matmul %97, %169, %cst_104 {dimension_numbers = #tpu.dot_dimension_numbers<[1], [0], [0], [1], [0, 0, 1, 1], [], []>} : vector<16x16xf32>, vector<16x16xf32>, vector<16x16xf32> -> vector<16x16xf32>
    %171 = arith.addf %167, %170 : vector<16x16xf32>
    %c6_105 = arith.constant 6 : index
    %c0_106 = arith.constant 0 : index
    %c0_107 = arith.constant 0 : index
    %172 = vector.load %arg9[%c6_105, %c0_106, %c0_107] : memref<7x16x16xf32, #tpu.memory_space<vmem>>, vector<1x16x16xf32>
    %173 = vector.shape_cast %172 : vector<1x16x16xf32> to vector<16x16xf32>
    %cst_108 = arith.constant dense<0.000000e+00> : vector<16x16xf32>
    %174 = tpu.matmul %173, %171, %cst_108 {dimension_numbers = #tpu.dot_dimension_numbers<[1], [0], [0], [1], [0, 0, 1, 1], [], []>} : vector<16x16xf32>, vector<16x16xf32>, vector<16x16xf32> -> vector<16x16xf32>
    %175 = arith.addf %164, %174 : vector<16x16xf32>
    %176 = arith.negf %175 : vector<16x16xf32>
    %177 = math.exp %176 : vector<16x16xf32>
    %cst_109 = arith.constant 1.000000e+00 : f32
    %178 = vector.broadcast %cst_109 : f32 to vector<16x16xf32>
    %179 = arith.addf %178, %177 : vector<16x16xf32>
    %180 = arith.divf %178, %179 : vector<16x16xf32>
    %c0_110 = arith.constant 0 : index
    %c0_111 = arith.constant 0 : index
    %181 = vector.load %arg7[%c0_110, %c0_111] : memref<16x512xf32, #tpu.memory_space<vmem>>, vector<16x512xf32>
    %cst_112 = arith.constant dense<0.000000e+00> : vector<16x512xf32>
    %182 = tpu.matmul %180, %181, %cst_112 {dimension_numbers = #tpu.dot_dimension_numbers<[1], [0], [0], [1], [0, 0, 1, 1], [], []>} : vector<16x16xf32>, vector<16x512xf32>, vector<16x512xf32> -> vector<16x512xf32>
    %183 = arith.mulf %73, %182 : vector<16x512xf32>
    %c0_113 = arith.constant 0 : index
    %c0_114 = arith.constant 0 : index
    %c0_115 = arith.constant 0 : index
    %184 = vector.load %arg10[%c0_113, %c0_114, %c0_115] : memref<1x16x512xf32, #tpu.memory_space<vmem>>, vector<1x16x512xf32>
    %185 = vector.shape_cast %184 : vector<1x16x512xf32> to vector<16x512xf32>
    %186 = vector.shape_cast %183 : vector<16x512xf32> to vector<1x16x512xf32>
    tpu.vector_store %arg10[%c0_113, %c0_114, %c0_115], %186 {strides = array<i32>} : memref<1x16x512xf32, #tpu.memory_space<vmem>>, vector<1x16x512xf32>,
    return
  }
  func.func @transform_0(%arg0: i32) -> (i32, i32, i32) {
    %c0_i32 = arith.constant 0 : i32
    %c0_i32_0 = arith.constant 0 : i32
    %c0_i32_1 = arith.constant 0 : i32
    return %arg0, %c0_i32, %c0_i32_0 : i32, i32, i32
  }
  func.func @transform_1(%arg0: i32) -> (i32, i32) {
    %c0_i32 = arith.constant 0 : i32
    %c0_i32_0 = arith.constant 0 : i32
    %c0_i32_1 = arith.constant 0 : i32
    return %c0_i32, %c0_i32_0 : i32, i32
  }
  func.func @transform_2(%arg0: i32) -> (i32, i32) {
    %c0_i32 = arith.constant 0 : i32
    %c0_i32_0 = arith.constant 0 : i32
    %c0_i32_1 = arith.constant 0 : i32
    return %c0_i32, %c0_i32_0 : i32, i32
  }
  func.func @transform_3(%arg0: i32) -> (i32, i32) {
    %c0_i32 = arith.constant 0 : i32
    %c0_i32_0 = arith.constant 0 : i32
    %c0_i32_1 = arith.constant 0 : i32
    return %c0_i32, %c0_i32_0 : i32, i32
  }
  func.func @transform_4(%arg0: i32) -> (i32, i32) {
    %c0_i32 = arith.constant 0 : i32
    %c0_i32_0 = arith.constant 0 : i32
    %c0_i32_1 = arith.constant 0 : i32
    return %c0_i32, %c0_i32_0 : i32, i32
  }
  func.func @transform_5(%arg0: i32) -> (i32, i32) {
    %c0_i32 = arith.constant 0 : i32
    %c0_i32_0 = arith.constant 0 : i32
    %c0_i32_1 = arith.constant 0 : i32
    return %c0_i32, %c0_i32_0 : i32, i32
  }
  func.func @transform_6(%arg0: i32) -> (i32, i32) {
    %c0_i32 = arith.constant 0 : i32
    %c0_i32_0 = arith.constant 0 : i32
    %c0_i32_1 = arith.constant 0 : i32
    return %c0_i32, %c0_i32_0 : i32, i32
  }
  func.func @transform_7(%arg0: i32) -> (i32, i32, i32) {
    %c0_i32 = arith.constant 0 : i32
    %c0_i32_0 = arith.constant 0 : i32
    %c0_i32_1 = arith.constant 0 : i32
    %c0_i32_2 = arith.constant 0 : i32
    return %c0_i32, %c0_i32_0, %c0_i32_1 : i32, i32, i32
  }
  func.func @transform_8(%arg0: i32) -> (i32, i32, i32) {
    %c0_i32 = arith.constant 0 : i32
    %c0_i32_0 = arith.constant 0 : i32
    %c0_i32_1 = arith.constant 0 : i32
    %c0_i32_2 = arith.constant 0 : i32
    return %c0_i32, %c0_i32_0, %c0_i32_1 : i32, i32, i32
  }
  func.func @transform_9(%arg0: i32) -> (i32, i32, i32) {
    %c0_i32 = arith.constant 0 : i32
    %c0_i32_0 = arith.constant 0 : i32
    %c0_i32_1 = arith.constant 0 : i32
    return %arg0, %c0_i32, %c0_i32_0 : i32, i32, i32
  }
}

</mosaic_0001>

<bundles_post_ra>
// kernel: tpu_custom_call.1
= control target key start
LH: loop header
LB: loop body
LE: loop exit
PB: predicated region body
PF: predicated region fallthrough
CT: control target
= control target key end

     0   :  { %14 = vsyncpa [#allocation3], 0  ;;  %s3433_s0 = inlined_call_operand.vmem [shape: f32[2,16,512], index: 0, kind: input, shape index: {}]   ;;  %s3434_s1 = inlined_call_operand.vmem [shape: f32[2,32], index: 1, kind: input, shape index: {}]   ;;  %s3435_s2 = inlined_call_operand.vmem [shape: f32[2,32], index: 2, kind: input, shape index: {}]   ;;  %s3436_s3 = inlined_call_operand.vmem [shape: f32[32,512], index: 3, kind: input, shape index: {}]   ;;  %s3437_s4 = inlined_call_operand.vmem [shape: f32[512,16], index: 4, kind: input, shape index: {}]   ;;  %s3438_s5 = inlined_call_operand.vmem [shape: f32[512,16], index: 5, kind: input, shape index: {}]   ;;  %s3439_s6 = inlined_call_operand.vmem [shape: f32[16,512], index: 6, kind: input, shape index: {}]   ;;  %s3440_s7 = inlined_call_operand.vmem [shape: f32[14,16,16], index: 7, kind: input, shape index: {}]   ;;  %s3441_s8 = inlined_call_operand.vmem [shape: f32[7,16,16], index: 8, kind: input, shape index: {}]   ;;  %s3442_s9 = inlined_call_operand.hbm [shape: f32[2,16,512], index: 9, kind: output, shape index: {}]  }
   0x1   :  { %16 = vsyncpa [#allocation3 + $0x1], 0  ;;  %s2459_s30 = smov 0   ;;  %s2461_s10 = smov 0  }
   0x2   :  { %s2463_s11 = smov 0   ;;  %s2465_s12 = smov 0  }
   0x3 LB: > { %s2480_s13 = sadd.s32 4294967295, %s2398_s12   ;;  %s2067_s14 = sadd.s32 4294967294, %s2398_s12   ;;  %s2398_s12 = sphi %s2465_s12, %s3448_s12   ;;  %s2394_s11 = sphi %s2463_s11, %s3447_s11   ;;  %s2390_s10 = sphi %s2461_s10, %s3446_s10   ;;  %s2386_s30 = sphi %s2459_s30, %s3445_s30  }
   0x4   : > { %s2484_s15 = sadd.s32 1, %s2398_s12   ;;  %s223_s16 = sadd.s32 1, %s2394_s11 }
   0x5   : > { %s220_s17 = ssub.s32 %s2398_s12, %s2484_s15  ;;  %p233_p0 = scmp.ne.s32.totalorder %s2394_s11, %s2390_s10 }
   0x6   : > { %p221_p1 = scmp.eq.s32.totalorder %s220_s17, 0  ;;  %p234_p2 = scmp.eq.s32.totalorder %s2480_s13, 1 }
   0x7   : > { %p239_p3 = scmp.ne.s32.totalorder %s2390_s10, %s2386_s30  ;;  %p240_p4 = scmp.eq.s32.totalorder %s2067_s14, 1 }
   0x8   : > { %s2495_s18 = scalar_select %p221_p1, %s2394_s11, %s223_s16  }
   0x9   : > { %p2497_p5 = por %p234_p2, %p233_p0  ;;  %p2501_p6 = por %p240_p4, %p239_p3 }
   0xa   : > { %p2070_p7 = scmp.ge.s32.totalorder %s2398_s12, 1  ;;  %p290_p8 = scmp.lt.s32.totalorder %s2398_s12, 3 }
   0xc   : > { %p291_p9 = pnand %p2070_p7, %p290_p8 }
   0xd   : > { %p326_p10 = scmp.lt.s32.totalorder (!%p291_p9), %s2480_s13, 1  ;;  %s2400_s26 = smov (!%p291_p9), 96  }
   0xe   : > { %294 = sbr.rel (%p291_p9) target bundleno = 2130 (0x852), region = 56  ;;  %s2401_s27 = smov (!%p291_p9), 64  }
   0xf   : > { %s2402_s24 = smov (!%p291_p9), 127   ;;  %s2406_s28 = smov (!%p291_p9), 112  }
  0x13   : > { %s327_s21 = scalar_select %p326_p10, %s2480_s13, 1  ;;  %vm407_vm0 = vcmask 785408   ;;  %vm432_vm1 = vcmask 523264   ;;  %vm504_vm2 = vcmask 254976   ;;  %vm567_vm6 = vcmask 261120  }
  0x14   : > { %vm843_vm8 = vcmask 1039360   ;;  %vm892_vm9 = vcmask 1031168   ;;  %vm941_vm10 = vcmask 1014784   ;;  %vm990_vm11 = vcmask 982016  }
  0x15   : > { %s2174_s22 = sshll.u32 %s327_s21, 6  ;;  %vm1039_vm12 = vcmask 916480   ;;  %vm1225_vm13 = vcmask 130048  }
  0x16   : > { %s330_s25 = scalar_lea.vmem %s3433_s0, %s2174_s22  ;;  %s323_s22 = sand.u32 1, %s2390_s10  }
  0x17   : > { %v2512_v0 = vld [vmem:[%s330_s25 + $0x10] sm:$0xff]  ;;  %v2516_v2 = vld [vmem:[%s330_s25] sm:$0xff]  ;;  %v2522_v5 = vld [vmem:[%s330_s25 + $0x18] sm:$0xff]  ;;  %s2071_s23 = sshll.u32 %s323_s22, 6  ;;  %s1990_s14 = scalar_lea.sflag [#allocation3], %s323_s22 }
  0x18   : > { %v2514_v1 = vld [vmem:[%s330_s25 + $0x30] sm:$0xff]  ;;  %v2520_v4 = vld [vmem:[%s330_s25 + $0x20] sm:$0xff]  ;;  %v2524_v6 = vld [vmem:[%s330_s25 + $0x38] sm:$0xff] }
  0x19   : > { %v353_v3 = vadd.f32 %v2514_v1, %v2512_v0  ;;  %v339_v7 = vadd.f32 %v2520_v4, %v2516_v2  ;;  %v360_v8 = vadd.f32 %v2524_v6, %v2522_v5  ;;  %v2530_v9 = vld [vmem:[%s330_s25 + $0x8] sm:$0xff]  ;;  %v381_v11 = vmax.f32 %v2512_v0, %v2514_v1 }
  0x1a   : > { %v2532_v10 = vld [vmem:[%s330_s25 + $0x28] sm:$0xff]  ;;  %v367_v12 = vmax.f32 %v2516_v2, %v2520_v4  ;;  %v388_v15 = vmax.f32 %v2522_v5, %v2524_v6  ;;  %s2403_s25 = smov 126  }
  0x1b   : > { %v354_v13 = vrot.slane %v353_v3, 4  ;;  %v346_v14 = vadd.f32 %v2532_v10, %v2530_v9  ;;  %v374_v16 = vmax.f32 %v2530_v9, %v2532_v10  ;;  %v340_v17 = vrot.slane %v339_v7, 4 }
  0x1c   : > { %v361_v18 = vrot.slane %v360_v8, 4  ;;  %v368_v19 = vrot.slane %v367_v12, 4  ;;  %v382_v25 = vrot.slane %v381_v11, 4  ;;  %v389_v29 = vrot.slane %v388_v15, 4 }
  0x1d   : > { %v355_v20 = vadd.f32 %v354_v13, %v353_v3  ;;  %v347_v21 = vrot.slane %v346_v14, 4  ;;  %v375_v22 = vrot.slane %v374_v16, 4  ;;  %v341_v23 = vadd.f32 %v340_v17, %v339_v7 }
  0x1e   : > { %v362_v24 = vadd.f32 %v361_v18, %v360_v8  ;;  %v369_v26 = vmax.f32 %v367_v12, %v368_v19  ;;  %v383_v41 = vmax.f32 %v381_v11, %v382_v25  ;;  %v390_v42 = vmax.f32 %v388_v15, %v389_v29 }
  0x1f   : > { %v356_v27 = vrot.slane %v355_v20, 2  ;;  %v348_v28 = vadd.f32 %v347_v21, %v346_v14  ;;  %v376_v30 = vmax.f32 %v374_v16, %v375_v22  ;;  %v342_v31 = vrot.slane %v341_v23, 2 }
  0x20   : > { %v363_v32 = vrot.slane %v362_v24, 2  ;;  %v370_v33 = vrot.slane %v369_v26, 2  ;;  %v391_v51 = vrot.slane %v390_v42, 2  ;;  %v384_v53 = vrot.slane %v383_v41, 2 }
  0x21   : > { %v357_v34 = vadd.f32 %v356_v27, %v355_v20  ;;  %v349_v35 = vrot.slane %v348_v28, 2  ;;  %v377_v36 = vrot.slane %v376_v30, 2  ;;  %v343_v37 = vadd.f32 %v342_v31, %v341_v23 }
  0x22   : > { %v371_v38 = vmax.f32 %v369_v26, %v370_v33  ;;  %v364_v40 = vadd.f32 %v363_v32, %v362_v24  ;;  %v392_v56 = vmax.f32 %v390_v42, %v391_v51  ;;  %v385_v58 = vmax.f32 %v383_v41, %v384_v53 }
  0x23   : > { %v358_v39 = vrot.slane %v357_v34, 1  ;;  %v344_v43 = vrot.slane %v343_v37, 1  ;;  %v350_v44 = vadd.f32 %v349_v35, %v348_v28  ;;  %v378_v46 = vmax.f32 %v376_v30, %v377_v36 }
  0x24   : > { %v372_v45 = vrot.slane %v371_v38, 1  ;;  %v365_v50 = vrot.slane %v364_v40, 1  ;;  %v393_v60 = vrot.slane %v392_v56, 1  ;;  %v386_v61 = vrot.slane %v385_v58, 1 }
  0x25   : > { %v359_v47 = vadd.f32 %v358_v39, %v357_v34  ;;  %v345_v48 = vadd.f32 %v344_v43, %v343_v37  ;;  %v351_v52 = vrot.slane %v350_v44, 1  ;;  %v379_v54 = vrot.slane %v378_v46, 1 }
  0x26   : > { %v373_v49 = vmax.f32 %v371_v38, %v372_v45  ;;  %v366_v55 = vadd.f32 %v365_v50, %v364_v40  ;;  %v394_v62 = vmax.f32 %v392_v56, %v393_v60  ;;  %v387_v63 = vmax.f32 %v385_v58, %v386_v61 }
  0x27   : > { %403 = vrot.lane.b32.xlu1 %v359_v47, %s2400_s26  ;;  %399 = vrot.lane.b32.xlu0 %v345_v48, %s2400_s26  ;;  %v352_v57 = vadd.f32 %v351_v52, %v350_v44  ;;  %v380_v59 = vmax.f32 %v378_v46, %v379_v54 }
  0x28   : > { %453 = vrot.lane.b32.xlu2 %v373_v49, %s2400_s26 }
  0x2f   : > { %405 = vrot.lane.b32.xlu1 %v366_v55, %s2400_s26  ;;  %401 = vrot.lane.b32.xlu0 %v352_v57, %s2400_s26 }
  0x30   : > { %455 = vrot.lane.b32.xlu2 %v380_v59, %s2400_s26 }
  0x37   : > { %459 = vrot.lane.b32.xlu1 %v394_v62, %s2400_s26  ;;  %457 = vrot.lane.b32.xlu0 %v387_v63, %s2400_s26  ;;  %s2404_s26 = smov 124  }
  0x82   : > { %v454_v8 = vpop.permute.xlu2 %453 }
  0x8a   : > { %v456_v19 = vpop.permute.xlu2 %455 }
  0x8b   : > { %v461_v21 = vsel %vm407_vm0, %v454_v8, %v456_v19 }
  0x8c   : > { %v469_v25 = vmax.f32 %v373_v49, %v461_v21  ;;  %v500_v49 = vld [vmem:[%s3434_s1] sm:$0x3]  ;;  %v565_v21 = vld [vmem:[%s3436_s3 + $0x70] sm:$0xff] }
  0x8d   : > { %623 = vmatpush.msra.mxu2 %v565_v21 }
  0x99   : > { %v404_v3 = vpop.permute.xlu1 %403  ;;  %v400_v7 = vpop.permute.xlu0 %399 }
  0xa1   : > { %v406_v11 = vpop.permute.xlu1 %405  ;;  %v402_v13 = vpop.permute.xlu0 %401 }
  0xa2   : > { %v410_v12 = vsel %vm407_vm0, %v404_v3, %v406_v11  ;;  %v408_v15 = vsel %vm407_vm0, %v400_v7, %v402_v13  ;;  %v409_v16 = vsel %vm407_vm0, %v402_v13, %v404_v3  ;;  %v415_v20 = vsel %vm407_vm0, %v406_v11, 0.0 }
  0xa3   : > { %v418_v14 = vadd.f32 %v410_v12, %v359_v47  ;;  %v416_v17 = vadd.f32 %v408_v15, %v345_v48  ;;  %v417_v18 = vadd.f32 %v409_v16, %v352_v57  ;;  %v419_v22 = vadd.f32 %v415_v20, %v366_v55  ;;  %v563_v20 = vld [vmem:[%s3436_s3 + $0x60] sm:$0xff] }
  0xa4   : > { %583 = vmatpush.msra.mxu1 %v563_v20  ;;  %v671_v20 = vld [vmem:[%s3437_s4 + $0x40] sm:$0xff] }
  0xa5   : > { %428 = vrot.lane.b32.xlu1 %v418_v14, %s2401_s27  ;;  %426 = vrot.lane.b32.xlu0 %v417_v18, %s2401_s27 }
  0xa6   : > { %424 = vrot.lane.b32.xlu2 %v416_v17, %s2401_s27 }
  0xa9   : > { %v458_v23 = vpop.permute.xlu0 %457  ;;  %v460_v27 = vpop.permute.xlu1 %459 }
  0xaa   : > { %v462_v24 = vsel %vm407_vm0, %v456_v19, %v458_v23  ;;  %v463_v28 = vsel %vm407_vm0, %v458_v23, %v460_v27  ;;  %v468_v29 = vsel %vm407_vm0, %v460_v27, 0.0  ;;  %v562_v27 = vld [vmem:[%s3436_s3 + $0x58] sm:$0xff] }
  0xab   : > { %v470_v26 = vmax.f32 %v380_v59, %v462_v24  ;;  %v471_v30 = vmax.f32 %v387_v63, %v463_v28  ;;  %v472_v31 = vmax.f32 %v394_v62, %v468_v29  ;;  %v555_v29 = vld [vmem:[%s3436_s3 + $0x20] sm:$0xff] }
  0xad   : > { %477 = vrot.lane.b32.xlu0 %v469_v25, %s2401_s27  ;;  %479 = vrot.lane.b32.xlu1 %v470_v26, %s2401_s27 }
  0xae   : > { %430 = vrot.lane.b32.xlu2 %v419_v22, %s2401_s27 }
  0xb5   : > { %483 = vrot.lane.b32.xlu0 %v472_v31, %s2401_s27 }
  0xb6   : > { %481 = vrot.lane.b32.xlu2 %v471_v30, %s2401_s27  ;;  %s2405_s27 = smov 120  }
 0x100   : > { %v425_v32 = vpop.permute.xlu2 %424 }
 0x108   : > { %v431_v33 = vpop.permute.xlu2 %430 }
 0x109   : > { %v440_v34 = vsel %vm432_vm1, %v431_v33, 0.0 }
 0x10a   : > { %v444_v38 = vadd.f32 %v440_v34, %v419_v22  ;;  %v566_v22 = vld [vmem:[%s3436_s3 + $0x78] sm:$0xff]  ;;  %v553_v34 = vld [vmem:[%s3436_s3 + $0x10] sm:$0xff] }
 0x10b   : > { %643 = vmatpush.msra.mxu3 %v566_v22  ;;  %v703_v22 = vld [vmem:[%s3437_s4 + $0x140] sm:$0xff] }
 0x10d   : > { %644 = vmatpush.msra.mxu3 %v562_v27  ;;  %v718_v27 = vld [vmem:[%s3437_s4 + $0x1b8] sm:$0xff] }
 0x110   : > { %v482_v52 = vpop.permute.xlu2 %481 }
 0x117   : > { %v429_v35 = vpop.permute.xlu1 %428  ;;  %v427_v37 = vpop.permute.xlu0 %426 }
 0x118   : > { %v435_v36 = vsel %vm432_vm1, %v429_v35, %v431_v33  ;;  %v433_v40 = vsel %vm432_vm1, %v425_v32, %v427_v37  ;;  %v434_v41 = vsel %vm432_vm1, %v427_v37, %v429_v35  ;;  %v551_v33 = vld [vmem:[%s3436_s3] sm:$0xff] }
 0x119   : > { %v443_v39 = vadd.f32 %v435_v36, %v418_v14  ;;  %v441_v42 = vadd.f32 %v433_v40, %v416_v17  ;;  %v442_v43 = vadd.f32 %v434_v41, %v417_v18  ;;  %v501_v14 = vld [vmem:[%s3435_s2] sm:$0x3]  ;;  %v554_v36 = vld [vmem:[%s3436_s3 + $0x18] sm:$0xff] }
 0x11b   : > { %v446_v44 = vadd.f32 %v444_v38, %v443_v39  ;;  %v445_v45 = vadd.f32 %v442_v43, %v441_v42 }
 0x11d   : > { %v447_v46 = vadd.f32 %v446_v44, %v445_v45 }
 0x11f   : > { %v478_v47 = vpop.permute.xlu0 %477  ;;  %v448_v48 = vmul.f32 0.00390625, %v447_v46  ;;  %v480_v50 = vpop.permute.xlu1 %479 }
 0x120   : > { %v486_v54 = vsel %vm432_vm1, %v480_v50, %v482_v52  ;;  %v485_v55 = vsel %vm432_vm1, %v478_v47, %v480_v50  ;;  %v564_v47 = vld [vmem:[%s3436_s3 + $0x68] sm:$0xff] }
 0x121   : > { %v502_v51 = vperm.slane %v448_v48, 0  ;;  %v494_v57 = vmax.f32 %v470_v26, %v486_v54  ;;  %v493_v58 = vmax.f32 %v469_v25, %v485_v55  ;;  %v559_v25 = vld [vmem:[%s3436_s3 + $0x40] sm:$0xff]  ;;  %v561_v26 = vld [vmem:[%s3436_s3 + $0x50] sm:$0xff]  ;;  %v560_v48 = vld [vmem:[%s3436_s3 + $0x48] sm:$0xff] }
 0x122   : > { %584 = vmatpush.msra.mxu1 %v559_v25  ;;  %624 = vmatpush.msra.mxu2 %v561_v26  ;;  %v556_v50 = vld [vmem:[%s3436_s3 + $0x28] sm:$0xff]  ;;  %v677_v54 = vld [vmem:[%s3437_s4 + $0x70] sm:$0xff]  ;;  %v710_v55 = vld [vmem:[%s3437_s4 + $0x178] sm:$0xff] }
 0x123   : > { %v503_v53 = vmul.f32 %v502_v51, %v500_v49  ;;  %v497_v3 = vmax.f32 %v493_v58, %v494_v57  ;;  %v676_v57 = vld [vmem:[%s3437_s4 + $0x68] sm:$0xff]  ;;  %v709_v58 = vld [vmem:[%s3437_s4 + $0x170] sm:$0xff]  ;;  %v670_v25 = vld [vmem:[%s3437_s4 + $0x38] sm:$0xff] }
 0x124   : > { %585 = vmatpush.msra.mxu1 %v555_v29  ;;  %v702_v26 = vld [vmem:[%s3437_s4 + $0x138] sm:$0xff]  ;;  %v669_v29 = vld [vmem:[%s3437_s4 + $0x30] sm:$0xff] }
 0x125   : > { %v505_v56 = vsel %vm504_vm2, %v503_v53, 0.0  ;;  %v678_v53 = vld [vmem:[%s3437_s4 + $0x78] sm:$0xff] }
 0x126   : > { %506 = vadd.xlane.f32.xlu1 %v505_v56  ;;  %586 = vmatpush.msra.mxu1 %v551_v33  ;;  %v726_v56 = vld [vmem:[%s3437_s4 + $0x1f8] sm:$0xff] }
 0x127   : > { %v484_v59 = vpop.permute.xlu0 %483  ;;  %727 = vmatpush.msra.mxu0 %v678_v53  ;;  %v700_v53 = vld [vmem:[%s3437_s4 + $0x128] sm:$0xff] }
 0x128   : > { %v487_v60 = vsel %vm432_vm1, %v482_v52, %v484_v59  ;;  %v492_v61 = vsel %vm432_vm1, %v484_v59, 0.0  ;;  %603 = vmatpush.msrb.mxu1 %v564_v47  ;;  %v552_v52 = vld [vmem:[%s3436_s3 + $0x8] sm:$0xff]  ;;  %v725_v59 = vld [vmem:[%s3437_s4 + $0x1f0] sm:$0xff] }
 0x129   : > { %v495_v62 = vmax.f32 %v471_v30, %v487_v60  ;;  %v496_v63 = vmax.f32 %v472_v31, %v492_v61  ;;  %v557_v30 = vld [vmem:[%s3436_s3 + $0x30] sm:$0xff]  ;;  %v558_v31 = vld [vmem:[%s3436_s3 + $0x38] sm:$0xff]  ;;  %728 = vmatpush.msra.mxu0 %v677_v54  ;;  %v675_v61 = vld [vmem:[%s3437_s4 + $0x60] sm:$0xff] }
 0x12a   : > { %625 = vmatpush.msra.mxu2 %v557_v30  ;;  %645 = vmatpush.msra.mxu3 %v558_v31  ;;  %v701_v31 = vld [vmem:[%s3437_s4 + $0x130] sm:$0xff]  ;;  %v716_v54 = vld [vmem:[%s3437_s4 + $0x1a8] sm:$0xff] }
 0x12b   : > { %v498_v7 = vmax.f32 %v495_v62, %v496_v63  ;;  %604 = vmatpush.msrb.mxu1 %v560_v48  ;;  %v708_v62 = vld [vmem:[%s3437_s4 + $0x168] sm:$0xff]  ;;  %729 = vmatpush.msra.mxu0 %v676_v57  ;;  %v689_v47 = vld [vmem:[%s3437_s4 + $0xd0] sm:$0xff]  ;;  %v699_v57 = vld [vmem:[%s3437_s4 + $0x120] sm:$0xff] }
 0x12c   : > { %626 = vmatpush.msra.mxu2 %v553_v34  ;;  %646 = vmatpush.msra.mxu3 %v554_v36  ;;  %v724_v63 = vld [vmem:[%s3437_s4 + $0x1e8] sm:$0xff] }
 0x12d   : > { %v499_v8 = vmax.f32 %v497_v3, %v498_v7  ;;  %605 = vmatpush.msrb.mxu1 %v556_v50  ;;  %v707_v7 = vld [vmem:[%s3437_s4 + $0x160] sm:$0xff]  ;;  %730 = vmatpush.msra.mxu0 %v675_v61  ;;  %v688_v48 = vld [vmem:[%s3437_s4 + $0xc8] sm:$0xff]  ;;  %v686_v50 = vld [vmem:[%s3437_s4 + $0xb8] sm:$0xff] }
 0x12e   : > { %773 = vmatpush.msrb.mxu2 %v710_v55  ;;  %796 = vmatpush.msrb.mxu3 %v726_v56  ;;  %v664_v55 = vld [vmem:[%s3437_s4 + $0x8] sm:$0xff]  ;;  %v698_v61 = vld [vmem:[%s3437_s4 + $0x118] sm:$0xff] }
 0x12f   : > { %v517_v11 = vperm.slane %v499_v8, 0  ;;  %606 = vmatpush.msrb.mxu1 %v552_v52  ;;  %v723_v8 = vld [vmem:[%s3437_s4 + $0x1e0] sm:$0xff]  ;;  %v685_v52 = vld [vmem:[%s3437_s4 + $0xb0] sm:$0xff]  ;;  %v684_v56 = vld [vmem:[%s3437_s4 + $0xa8] sm:$0xff] }
 0x130   : > { %774 = vmatpush.msrb.mxu2 %v709_v58  ;;  %797 = vmatpush.msrb.mxu3 %v725_v59  ;;  %v715_v58 = vld [vmem:[%s3437_s4 + $0x1a0] sm:$0xff] }
 0x131   : > { %v518_v12 = vmul.f32 %v517_v11, %v500_v49  ;;  %v674_v11 = vld [vmem:[%s3437_s4 + $0x58] sm:$0xff]  ;;  %v663_v59 = vld [vmem:[%s3437_s4] sm:$0xff] }
 0x132   : > { %775 = vmatpush.msrb.mxu2 %v708_v62  ;;  %798 = vmatpush.msrb.mxu3 %v724_v63  ;;  %v714_v62 = vld [vmem:[%s3437_s4 + $0x198] sm:$0xff] }
 0x133   : > { %v519_v13 = vsel %vm504_vm2, %v518_v12, 0.0  ;;  %v706_v12 = vld [vmem:[%s3437_s4 + $0x158] sm:$0xff]  ;;  %731 = vmatpush.msra.mxu0 %v674_v11  ;;  %v696_v11 = vld [vmem:[%s3437_s4 + $0x108] sm:$0xff] }
 0x134   : > { %520 = vadd.xlane.f32.xlu2 %v519_v13  ;;  %v722_v13 = vld [vmem:[%s3437_s4 + $0x1d8] sm:$0xff]  ;;  %776 = vmatpush.msrb.mxu2 %v707_v7  ;;  %v713_v7 = vld [vmem:[%s3437_s4 + $0x190] sm:$0xff] }
 0x135   : > { %799 = vmatpush.msrb.mxu3 %v723_v8  ;;  %v682_v63 = vld [vmem:[%s3437_s4 + $0x98] sm:$0xff]  ;;  %v681_v8 = vld [vmem:[%s3437_s4 + $0x90] sm:$0xff] }
 0x136   : > { %777 = vmatpush.msrb.mxu2 %v706_v12  ;;  %v712_v12 = vld [vmem:[%s3437_s4 + $0x188] sm:$0xff] }
 0x137   : > { %800 = vmatpush.msrb.mxu3 %v722_v13  ;;  %v680_v13 = vld [vmem:[%s3437_s4 + $0x88] sm:$0xff] }
 0x199   : > { %v507_v15 = vpop.xlane.xlu1 %506 }
 0x19a   : > { %v508_v16 = vmax.f32 %v507_v15, 0.0  ;;  %v705_v15 = vld [vmem:[%s3437_s4 + $0x150] sm:$0xff] }
 0x19b   : > { %778 = vmatpush.msrb.mxu2 %v705_v15  ;;  %v711_v15 = vld [vmem:[%s3437_s4 + $0x180] sm:$0xff] }
 0x19c   : > { %v509_v17 = vmul.f32 %v508_v16, %v501_v14  ;;  %v721_v16 = vld [vmem:[%s3437_s4 + $0x1d0] sm:$0xff] }
 0x19d   : > { %801 = vmatpush.msrb.mxu3 %v721_v16  ;;  %v679_v16 = vld [vmem:[%s3437_s4 + $0x80] sm:$0xff] }
 0x19e   : > { %v510_v18 = vsel %vm504_vm2, %v509_v17, 0.0  ;;  %v672_v17 = vld [vmem:[%s3437_s4 + $0x48] sm:$0xff] }
 0x19f   : > { %v511_v19 = vrot.slane %v510_v18, 4 }
 0x1a1   : > { %v512_v23 = vadd.f32 %v511_v19, %v510_v18  ;;  %v704_v18 = vld [vmem:[%s3437_s4 + $0x148] sm:$0xff] }
 0x1a2   : > { %v720_v19 = vld [vmem:[%s3437_s4 + $0x1c8] sm:$0xff]  ;;  %779 = vmatpush.msrb.mxu2 %v704_v18 }
 0x1a3   : > { %v513_v35 = vrot.slane %v512_v23, 2  ;;  %802 = vmatpush.msrb.mxu3 %v720_v19 }
 0x1a4   : > { %780 = vmatpush.msrb.mxu2 %v703_v22 }
 0x1a5   : > { %v514_v39 = vadd.f32 %v513_v35, %v512_v23  ;;  %v719_v23 = vld [vmem:[%s3437_s4 + $0x1c0] sm:$0xff]  ;;  %v668_v35 = vld [vmem:[%s3437_s4 + $0x28] sm:$0xff] }
 0x1a6   : > { %803 = vmatpush.msrb.mxu3 %v719_v23  ;;  %781 = vmatpush.msrb.mxu2 %v702_v26 }
 0x1a7   : > { %v521_v24 = vpop.xlane.xlu2 %520  ;;  %v515_v42 = vrot.slane %v514_v39, 1 }
 0x1a8   : > { %v522_v28 = vmax.f32 %v521_v24, 0.0  ;;  %804 = vmatpush.msrb.mxu3 %v718_v27  ;;  %782 = vmatpush.msrb.mxu2 %v701_v31 }
 0x1a9   : > { %v516_v45 = vadd.f32 %v515_v42, %v514_v39  ;;  %v666_v42 = vld [vmem:[%s3437_s4 + $0x18] sm:$0xff] }
 0x1aa   : > { %v523_v32 = vmul.f32 %v522_v28, %v501_v14  ;;  %v673_v14 = vld [vmem:[%s3437_s4 + $0x50] sm:$0xff]  ;;  %783 = vmatpush.msrb.mxu2 %v700_v53 }
 0x1ab   : > { %732 = vmatpush.msra.mxu0 %v673_v14  ;;  %v695_v14 = vld [vmem:[%s3437_s4 + $0x100] sm:$0xff] }
 0x1ac   : > { %v524_v37 = vsel %vm504_vm2, %v523_v32, 0.0  ;;  %v717_v32 = vld [vmem:[%s3437_s4 + $0x1b0] sm:$0xff]  ;;  %784 = vmatpush.msrb.mxu2 %v699_v57 }
 0x1ad   : > { %v525_v38 = vrot.slane %v524_v37, 4  ;;  %733 = vmatpush.msra.mxu0 %v672_v17  ;;  %805 = vmatpush.msrb.mxu3 %v717_v32 }
 0x1ae   : > { %785 = vmatpush.msrb.mxu2 %v698_v61 }
 0x1af   : > { %v526_v40 = vadd.f32 %v525_v38, %v524_v37  ;;  %734 = vmatpush.msra.mxu0 %v671_v20  ;;  %v667_v37 = vld [vmem:[%s3437_s4 + $0x20] sm:$0xff]  ;;  %806 = vmatpush.msrb.mxu3 %v716_v54 }
 0x1b1   : > { %v527_v41 = vrot.slane %v526_v40, 2  ;;  %735 = vmatpush.msra.mxu0 %v670_v25  ;;  %807 = vmatpush.msrb.mxu3 %v715_v58 }
 0x1b3   : > { %v528_v43 = vadd.f32 %v527_v41, %v526_v40  ;;  %736 = vmatpush.msra.mxu0 %v669_v29  ;;  %v694_v40 = vld [vmem:[%s3437_s4 + $0xf8] sm:$0xff]  ;;  %808 = vmatpush.msrb.mxu3 %v714_v62 }
 0x1b5   : > { %v529_v44 = vrot.slane %v528_v43, 1  ;;  %737 = vmatpush.msra.mxu0 %v668_v35  ;;  %809 = vmatpush.msrb.mxu3 %v713_v7 }
 0x1b7   : > { %v530_v46 = vadd.f32 %v529_v44, %v528_v43  ;;  %738 = vmatpush.msra.mxu0 %v667_v37  ;;  %v693_v43 = vld [vmem:[%s3437_s4 + $0xf0] sm:$0xff]  ;;  %v692_v44 = vld [vmem:[%s3437_s4 + $0xe8] sm:$0xff]  ;;  %810 = vmatpush.msrb.mxu3 %v712_v12 }
 0x1b9   : > { %v531_v49 = vadd.f32 %v530_v46, %v516_v45  ;;  %739 = vmatpush.msra.mxu0 %v666_v42  ;;  %v691_v45 = vld [vmem:[%s3437_s4 + $0xe0] sm:$0xff]  ;;  %v690_v46 = vld [vmem:[%s3437_s4 + $0xd8] sm:$0xff]  ;;  %811 = vmatpush.msrb.mxu3 %v711_v15 }
 0x1bb   : > { %v2074_v51 = vmul.f32 -1.442695, %v531_v49  ;;  %v687_v49 = vld [vmem:[%s3437_s4 + $0xc0] sm:$0xff] }
 0x1bd   : > { %2324 = vpow2.f32 %v2074_v51  ;;  %v665_v51 = vld [vmem:[%s3437_s4 + $0x10] sm:$0xff] }
 0x1be   : > { %740 = vmatpush.msra.mxu0 %v665_v51 }
 0x1c0   : > { %741 = vmatpush.msra.mxu0 %v664_v55 }
 0x1c2   : > { %742 = vmatpush.msra.mxu0 %v663_v59 }
 0x1c3   : > { %v2325_v60 = vpop.eup %2324 }
 0x1c4   : > { %v2648_v3 = vadd.f32 1.0, %v2325_v60  ;;  %v683_v60 = vld [vmem:[%s3437_s4 + $0xa0] sm:$0xff] }
 0x1c6   : > { %2326 = vrcp.f32 %v2648_v3  ;;  %v547_v30 = vand.u32 2147483648, %v2648_v3  ;;  %v545_v34 = vand.u32 2147483647, %v2648_v3  ;;  %vm541_vm4 = vweird.f32 %v2648_v3 }
 0x1c8   : > { %v548_v38 = vor.u32 1.1754944e-38, %v547_v30  ;;  %vm546_vm7 = vcmp.eq.f32.partialorder %v545_v34, 8.507059e+37 }
 0x1cc   : > { %v2327_v21 = vpop.eup %2326 }
 0x1cd   : > { %v537_v24 = vmul.f32 %v2327_v21, %v2648_v3  ;;  %vm542_vm3 = vweird.f32 %v2327_v21  ;;  %v697_v3 = vld [vmem:[%s3437_s4 + $0x110] sm:$0xff] }
 0x1ce   : > { %vm543_vm5 = vmor %vm541_vm4, %vm542_vm3  ;;  %786 = vmatpush.msrb.mxu2 %v697_v3 }
 0x1cf   : > { %v538_v28 = vsub.f32 1.0, %v537_v24 }
 0x1d0   : > { %787 = vmatpush.msrb.mxu2 %v696_v11 }
 0x1d1   : > { %v539_v33 = vmul.f32 %v2327_v21, %v538_v28 }
 0x1d2   : > { %788 = vmatpush.msrb.mxu2 %v695_v14 }
 0x1d3   : > { %v540_v36 = vadd.f32 %v2327_v21, %v539_v33 }
 0x1d5   : > { %v544_v39 = vsel %vm543_vm5, %v2327_v21, %v540_v36 }
 0x1d6   : > { %v549_v41 = vsel %vm546_vm7, %v548_v38, %v544_v39 }
 0x1d7   : > { %2075 = vmatmul.msk.f32.vlgmr.msra.gmra.mxu1 %vm567_vm6, %v549_v41  ;;  %2077 = vmatmul.msk.f32.vlgmr.msra.gmra.mxu2 %vm567_vm6, %v549_v41 }
 0x1d8   : > { %2078 = vmatmul.msk.f32.vlgmr.msra.gmra.mxu3 %vm567_vm6, %v549_v41  ;;  %750 = vmatpush.msra.mxu1 %v694_v40 }
 0x1da   : > { %751 = vmatpush.msra.mxu1 %v693_v43 }
 0x1dc   : > { %752 = vmatpush.msra.mxu1 %v692_v44 }
 0x1de   : > { %753 = vmatpush.msra.mxu1 %v691_v45 }
 0x1df   : > { %2076 = vmatmul.msk.f32.vlgmr.msrb.gmra.mxu1 %vm567_vm6, %v549_v41 }
 0x1e0   : > { %754 = vmatpush.msra.mxu1 %v690_v46 }
 0x1e2   : > { %755 = vmatpush.msra.mxu1 %v689_v47 }
 0x1e4   : > { %756 = vmatpush.msra.mxu1 %v688_v48 }
 0x1e6   : > { %757 = vmatpush.msra.mxu1 %v687_v49 }
 0x1e8   : > { %758 = vmatpush.msra.mxu1 %v686_v50 }
 0x1ea   : > { %759 = vmatpush.msra.mxu1 %v685_v52 }
 0x1ec   : > { %760 = vmatpush.msra.mxu1 %v684_v56 }
 0x1ee   : > { %761 = vmatpush.msra.mxu1 %v683_v60 }
 0x1f0   : > { %762 = vmatpush.msra.mxu1 %v682_v63 }
 0x1f2   : > { %763 = vmatpush.msra.mxu1 %v681_v8 }
 0x1f4   : > { %764 = vmatpush.msra.mxu1 %v680_v13 }
 0x1f6   : > { %765 = vmatpush.msra.mxu1 %v679_v16 }
 0x254   : > { %v588_v17 = vpop.f32.mrf.mxu1 }
 0x255   : > { %v651_v18 = vperm.slane %v588_v17, 0 }
 0x257   : > { %v2822_v19 = vmul.f32 %v651_v18, %v2516_v2  ;;  %v2832_v28 = vmul.f32 %v651_v18, %v2520_v4 }
 0x259   : > { %743 = vmatmul.f32.vlgmr.msra.gmra.mxu0 %v2822_v19 }
 0x25a   : > { %v628_v20 = vpop.f32.mrf.mxu2 }
 0x25b   : > { %v653_v21 = vperm.slane %v628_v20, 0  ;;  %v648_v22 = vpop.f32.mrf.mxu3 }
 0x25c   : > { %v654_v23 = vperm.slane %v648_v22, 0  ;;  %v608_v24 = vpop.f32.mrf.mxu1 }
 0x25d   : > { %v2826_v25 = vmul.f32 %v653_v21, %v2512_v0  ;;  %v652_v26 = vperm.slane %v608_v24, 0  ;;  %v2844_v0 = vmul.f32 %v653_v21, %v2514_v1 }
 0x25e   : > { %v2829_v27 = vmul.f32 %v654_v23, %v2522_v5  ;;  %v2847_v4 = vmul.f32 %v654_v23, %v2524_v6 }
 0x25f   : > { %v2835_v2 = vmul.f32 %v652_v26, %v2530_v9  ;;  %789 = vmatmul.f32.vlgmr.msrb.gmra.mxu2 %v2826_v25  ;;  %v2850_v5 = vmul.f32 %v652_v26, %v2532_v10 }
 0x260   : > { %812 = vmatmul.f32.vlgmr.msrb.gmra.mxu3 %v2829_v27  ;;  %v2224_v29 = vpack.i.bf16 %v2829_v27, %v2826_v25  ;;  %v2229_v9 = vpack.i.bf16 %v2847_v4, %v2844_v0 }
 0x261   : > { %746 = vmatmul.f32.gmra.mxu0 %v2832_v28  ;;  %766 = vmatmul.f32.vlgmr.msra.gmra.mxu1 %v2835_v2  ;;  %v2234_v1 = vpack.i.bf16 %v2835_v2, %v2822_v19  ;;  %v2239_v6 = vpack.i.bf16 %v2850_v5, %v2832_v28 }
 0x262   : > { %2225 = vrot.lane.b32.xlu0 %v2224_v29, %s2402_s24 }
 0x267   : > { %792 = vmatmul.f32.gmra.mxu2 %v2844_v0 }
 0x268   : > { %815 = vmatmul.f32.gmra.mxu3 %v2847_v4 }
 0x269   : > { %769 = vmatmul.f32.gmra.mxu1 %v2850_v5 }
 0x26a   : > { %2230 = vrot.lane.b32.xlu0 %v2229_v9, %s2402_s24 }
 0x272   : > { %2235 = vrot.lane.b32.xlu0 %v2234_v1, %s2402_s24 }
 0x27a   : > { %2240 = vrot.lane.b32.xlu0 %v2239_v6, %s2402_s24  ;;  %s325_s24 = scalar_lea.vmem [#allocation2], %s2071_s23 }
 0x2d4   : > { %v2226_v10 = vpop.permute.xlu0 %2225 }
 0x2d5   : > { %v2228_v30 = vunpack.i.h.bf16 %v2226_v10  ;;  %v2227_v31 = vunpack.i.l.bf16 %v2226_v10 }
 0x2d7   : > { %v858_v32 = vsel %vm843_vm8, %v2228_v30, 0.0  ;;  %v846_v33 = vsel %vm843_vm8, %v2227_v31, %v2228_v30 }
 0x2d8   : > { %v863_v34 = vmax.f32 %v2829_v27, %v858_v32  ;;  %v862_v35 = vmax.f32 %v2826_v25, %v846_v33 }
 0x2da   : > { %v2244_v36 = vpack.i.bf16 %v863_v34, %v862_v35 }
 0x2dc   : > { %v2231_v37 = vpop.permute.xlu0 %2230  ;;  %2245 = vrot.lane.b32.xlu0 %v2244_v36, %s2403_s25 }
 0x2dd   : > { %v2233_v38 = vunpack.i.h.bf16 %v2231_v37  ;;  %v2232_v39 = vunpack.i.l.bf16 %v2231_v37 }
 0x2df   : > { %v859_v40 = vsel %vm843_vm8, %v2233_v38, 0.0  ;;  %v849_v41 = vsel %vm843_vm8, %v2232_v39, %v2233_v38 }
 0x2e0   : > { %v867_v42 = vmax.f32 %v2847_v4, %v859_v40  ;;  %v866_v43 = vmax.f32 %v2844_v0, %v849_v41 }
 0x2e2   : > { %v2254_v44 = vpack.i.bf16 %v867_v42, %v866_v43 }
 0x2e4   : > { %2255 = vrot.lane.b32.xlu1 %v2254_v44, %s2403_s25  ;;  %v2236_v45 = vpop.permute.xlu0 %2235 }
 0x2e5   : > { %v2238_v46 = vunpack.i.h.bf16 %v2236_v45  ;;  %v2237_v47 = vunpack.i.l.bf16 %v2236_v45 }
 0x2e7   : > { %v845_v48 = vsel %vm843_vm8, %v2238_v46, %v2227_v31  ;;  %v844_v49 = vsel %vm843_vm8, %v2237_v47, %v2238_v46 }
 0x2e8   : > { %v860_v50 = vmax.f32 %v2822_v19, %v844_v49  ;;  %v861_v51 = vmax.f32 %v2835_v2, %v845_v48 }
 0x2ea   : > { %v2249_v52 = vpack.i.bf16 %v861_v51, %v860_v50 }
 0x2ec   : > { %v2241_v53 = vpop.permute.xlu0 %2240  ;;  %2250 = vrot.lane.b32.xlu2 %v2249_v52, %s2403_s25 }
 0x2ed   : > { %v2243_v54 = vunpack.i.h.bf16 %v2241_v53  ;;  %v2242_v55 = vunpack.i.l.bf16 %v2241_v53 }
 0x2ef   : > { %v848_v56 = vsel %vm843_vm8, %v2243_v54, %v2232_v39  ;;  %v847_v57 = vsel %vm843_vm8, %v2242_v55, %v2243_v54 }
 0x2f0   : > { %v864_v58 = vmax.f32 %v2832_v28, %v847_v57  ;;  %v865_v59 = vmax.f32 %v2850_v5, %v848_v56 }
 0x2f2   : > { %v2259_v60 = vpack.i.bf16 %v865_v59, %v864_v58 }
 0x2f4   : > { %2260 = vrot.lane.b32.xlu0 %v2259_v60, %s2403_s25  ;;  %s2175_s25 = sshll.u32 %s2480_s13, 6  ;;  %s2002_s13 = sshll.u32 %s325_s24, 4  ;;  %s2003_s13 = int_to_ptr.vmem [resolvable:$true] %s2002_s13 }
 0x346   : > { %v2251_v3 = vpop.permute.xlu2 %2250 }
 0x347   : > { %v2253_v13 = vunpack.i.h.bf16 %v2251_v3  ;;  %v2252_v14 = vunpack.i.l.bf16 %v2251_v3 }
 0x349   : > { %v893_v18 = vsel %vm892_vm9, %v2252_v14, %v2253_v13 }
 0x34a   : > { %v909_v9 = vmax.f32 %v860_v50, %v893_v18 }
 0x34e   : > { %v2246_v61 = vpop.permute.xlu0 %2245 }
 0x34f   : > { %v2248_v62 = vunpack.i.h.bf16 %v2246_v61  ;;  %v2247_v63 = vunpack.i.l.bf16 %v2246_v61 }
 0x351   : > { %v907_v7 = vsel %vm892_vm9, %v2248_v62, 0.0  ;;  %v895_v8 = vsel %vm892_vm9, %v2247_v63, %v2248_v62  ;;  %v894_v16 = vsel %vm892_vm9, %v2253_v13, %v2247_v63 }
 0x352   : > { %v912_v11 = vmax.f32 %v863_v34, %v907_v7  ;;  %v911_v12 = vmax.f32 %v862_v35, %v895_v8  ;;  %v910_v22 = vmax.f32 %v861_v51, %v894_v16 }
 0x354   : > { %v2264_v15 = vpack.i.bf16 %v912_v11, %v911_v12  ;;  %v2269_v6 = vpack.i.bf16 %v910_v22, %v909_v9 }
 0x356   : > { %v2256_v17 = vpop.permute.xlu1 %2255  ;;  %2265 = vrot.lane.b32.xlu0 %v2264_v15, %s2404_s26 }
 0x357   : > { %v2258_v20 = vunpack.i.h.bf16 %v2256_v17  ;;  %v2257_v21 = vunpack.i.l.bf16 %v2256_v17 }
 0x359   : > { %v908_v23 = vsel %vm892_vm9, %v2258_v20, 0.0  ;;  %v898_v24 = vsel %vm892_vm9, %v2257_v21, %v2258_v20 }
 0x35a   : > { %v916_v26 = vmax.f32 %v867_v42, %v908_v23  ;;  %v915_v29 = vmax.f32 %v866_v43, %v898_v24 }
 0x35c   : > { %v2274_v1 = vpack.i.bf16 %v916_v26, %v915_v29 }
 0x35e   : > { %2275 = vrot.lane.b32.xlu2 %v2274_v1, %s2404_s26  ;;  %2270 = vrot.lane.b32.xlu0 %v2269_v6, %s2404_s26  ;;  %v1110_v1 = vld [vmem:[%s3438_s5 + $0x170] sm:$0xff] }
 0x366   : > { %v2261_v10 = vpop.permute.xlu0 %2260 }
 0x367   : > { %v2263_v30 = vunpack.i.h.bf16 %v2261_v10  ;;  %v2262_v31 = vunpack.i.l.bf16 %v2261_v10 }
 0x369   : > { %v897_v32 = vsel %vm892_vm9, %v2263_v30, %v2257_v21  ;;  %v896_v33 = vsel %vm892_vm9, %v2262_v31, %v2263_v30  ;;  %v1126_v31 = vld [vmem:[%s3438_s5 + $0x1f0] sm:$0xff] }
 0x36a   : > { %v913_v34 = vmax.f32 %v864_v58, %v896_v33  ;;  %v914_v35 = vmax.f32 %v865_v59, %v897_v32  ;;  %v1109_v32 = vld [vmem:[%s3438_s5 + $0x168] sm:$0xff] }
 0x36b   : > { %v1125_v33 = vld [vmem:[%s3438_s5 + $0x1e8] sm:$0xff] }
 0x36c   : > { %v2279_v36 = vpack.i.bf16 %v914_v35, %v913_v34 }
 0x36e   : > { %2280 = vrot.lane.b32.xlu1 %v2279_v36, %s2404_s26 }
 0x3b8   : > { %v2276_v37 = vpop.permute.xlu2 %2275 }
 0x3b9   : > { %v2278_v38 = vunpack.i.h.bf16 %v2276_v37  ;;  %v2277_v39 = vunpack.i.l.bf16 %v2276_v37 }
 0x3bb   : > { %v957_v40 = vsel %vm941_vm10, %v2278_v38, 0.0  ;;  %v947_v41 = vsel %vm941_vm10, %v2277_v39, %v2278_v38 }
 0x3bc   : > { %v965_v42 = vmax.f32 %v916_v26, %v957_v40  ;;  %v964_v43 = vmax.f32 %v915_v29, %v947_v41  ;;  %v1111_v29 = vld [vmem:[%s3438_s5 + $0x178] sm:$0xff]  ;;  %v1108_v41 = vld [vmem:[%s3438_s5 + $0x160] sm:$0xff] }
 0x3bd   : > { %1174 = vmatpush.msra.mxu2 %v1111_v29  ;;  %v1097_v29 = vld [vmem:[%s3438_s5 + $0x108] sm:$0xff] }
 0x3be   : > { %v2294_v44 = vpack.i.bf16 %v965_v42, %v964_v43 }
 0x3bf   : > { %1175 = vmatpush.msra.mxu2 %v1110_v1  ;;  %v1076_v1 = vld [vmem:[%s3438_s5 + $0x60] sm:$0xff] }
 0x3c0   : > { %2295 = vrot.lane.b32.xlu1 %v2294_v44, %s2405_s27 }
 0x3c1   : > { %1176 = vmatpush.msra.mxu2 %v1109_v32  ;;  %v1091_v32 = vld [vmem:[%s3438_s5 + $0xd8] sm:$0xff] }
 0x3c3   : > { %1177 = vmatpush.msra.mxu2 %v1108_v41  ;;  %v1072_v41 = vld [vmem:[%s3438_s5 + $0x40] sm:$0xff] }
 0x3c8   : > { %v2266_v45 = vpop.permute.xlu0 %2265 }
 0x3c9   : > { %v2268_v46 = vunpack.i.h.bf16 %v2266_v45  ;;  %v2267_v47 = vunpack.i.l.bf16 %v2266_v45  ;;  %v1107_v45 = vld [vmem:[%s3438_s5 + $0x158] sm:$0xff] }
 0x3ca   : > { %1178 = vmatpush.msra.mxu2 %v1107_v45  ;;  %v1070_v45 = vld [vmem:[%s3438_s5 + $0x30] sm:$0xff] }
 0x3cb   : > { %v956_v48 = vsel %vm941_vm10, %v2268_v46, 0.0  ;;  %v944_v49 = vsel %vm941_vm10, %v2267_v47, %v2268_v46  ;;  %v1123_v46 = vld [vmem:[%s3438_s5 + $0x1d8] sm:$0xff] }
 0x3cc   : > { %v961_v50 = vmax.f32 %v912_v11, %v956_v48  ;;  %v960_v51 = vmax.f32 %v911_v12, %v944_v49  ;;  %v1122_v48 = vld [vmem:[%s3438_s5 + $0x1d0] sm:$0xff]  ;;  %v1079_v49 = vld [vmem:[%s3438_s5 + $0x78] sm:$0xff] }
 0x3cd   : > { %1128 = vmatpush.msrb.mxu0 %v1079_v49  ;;  %v2086_v49 = vld [vmem:[%s3440_s7 + $0x28] sm:$0xff] }
 0x3ce   : > { %v2284_v52 = vpack.i.bf16 %v961_v50, %v960_v51 }
 0x3d0   : > { %2285 = vrot.lane.b32.xlu0 %v2284_v52, %s2405_s27  ;;  %v2271_v53 = vpop.permute.xlu0 %2270  ;;  %v1121_v52 = vld [vmem:[%s3438_s5 + $0x1c8] sm:$0xff] }
 0x3d1   : > { %v2273_v54 = vunpack.i.h.bf16 %v2271_v53  ;;  %v2272_v55 = vunpack.i.l.bf16 %v2271_v53  ;;  %v1104_v53 = vld [vmem:[%s3438_s5 + $0x140] sm:$0xff] }
 0x3d3   : > { %v943_v56 = vsel %vm941_vm10, %v2273_v54, %v2267_v47  ;;  %v942_v57 = vsel %vm941_vm10, %v2272_v55, %v2273_v54  ;;  %v1106_v47 = vld [vmem:[%s3438_s5 + $0x150] sm:$0xff]  ;;  %v1120_v54 = vld [vmem:[%s3438_s5 + $0x1c0] sm:$0xff]  ;;  %v1103_v55 = vld [vmem:[%s3438_s5 + $0x138] sm:$0xff] }
 0x3d4   : > { %v958_v58 = vmax.f32 %v909_v9, %v942_v57  ;;  %v959_v59 = vmax.f32 %v910_v22, %v943_v56  ;;  %v1127_v9 = vld [vmem:[%s3438_s5 + $0x1f8] sm:$0xff]  ;;  %1179 = vmatpush.msra.mxu2 %v1106_v47  ;;  %v1102_v57 = vld [vmem:[%s3438_s5 + $0x130] sm:$0xff]  ;;  %v1069_v47 = vld [vmem:[%s3438_s5 + $0x28] sm:$0xff] }
 0x3d5   : > { %1197 = vmatpush.msra.mxu3 %v1127_v9  ;;  %v1119_v56 = vld [vmem:[%s3438_s5 + $0x1b8] sm:$0xff]  ;;  %v1113_v9 = vld [vmem:[%s3438_s5 + $0x188] sm:$0xff] }
 0x3d6   : > { %v2289_v60 = vpack.i.bf16 %v959_v59, %v958_v58 }
 0x3d7   : > { %1198 = vmatpush.msra.mxu3 %v1126_v31  ;;  %v1075_v31 = vld [vmem:[%s3438_s5 + $0x58] sm:$0xff] }
 0x3d8   : > { %2290 = vrot.lane.b32.xlu2 %v2289_v60, %s2405_s27  ;;  %v1117_v60 = vld [vmem:[%s3438_s5 + $0x1a8] sm:$0xff] }
 0x3d9   : > { %1199 = vmatpush.msra.mxu3 %v1125_v33  ;;  %v1074_v33 = vld [vmem:[%s3438_s5 + $0x50] sm:$0xff] }
 0x3e0   : > { %v2281_v61 = vpop.permute.xlu1 %2280 }
 0x3e1   : > { %v2283_v62 = vunpack.i.h.bf16 %v2281_v61  ;;  %v2282_v63 = vunpack.i.l.bf16 %v2281_v61  ;;  %v1100_v61 = vld [vmem:[%s3438_s5 + $0x120] sm:$0xff] }
 0x3e3   : > { %v945_v3 = vsel %vm941_vm10, %v2282_v63, %v2283_v62  ;;  %v946_v7 = vsel %vm941_vm10, %v2283_v62, %v2277_v39  ;;  %v1116_v62 = vld [vmem:[%s3438_s5 + $0x1a0] sm:$0xff]  ;;  %v1099_v63 = vld [vmem:[%s3438_s5 + $0x118] sm:$0xff] }
 0x3e4   : > { %v2893_v8 = vmax.f32 %v913_v34, %v945_v3  ;;  %v2895_v11 = vmax.f32 %v914_v35, %v946_v7  ;;  %v1115_v3 = vld [vmem:[%s3438_s5 + $0x198] sm:$0xff] }
 0x3e6   : > { %v2299_v12 = vpack.i.bf16 %v2895_v11, %v2893_v8 }
 0x3e8   : > { %2300 = vrot.lane.b32.xlu0 %v2299_v12, %s2405_s27  ;;  %s2001_s27 = scalar_lea.hbm %s3442_s9, %s2175_s25  ;;  %s2356_s25 = scalar_lea.hbm %s3442_s9, 128 }
 0x3e9   : > { %s2004_s29 = sshll.u32 %s2001_s27, 4  ;;  %s2005_s29 = int_to_ptr.hbm [resolvable:$true] %s2004_s29 }
 0x3ea   : > { %s2350_s16 = sshra.s32 %s2005_s29, 4  ;;  %s2351_s16 = int_to_ptr.hbm [resolvable:$true] %s2350_s16 }
 0x3eb   : > { %s2352_s17 = scalar_lea.hbm %s2351_s16, 64  ;;  %p2357_p0 = scmp.lt.s32.totalorder %s2351_s16, %s3442_s9 }
 0x3ec   : > { %p2353_p11 = scmp.ne.s32.totalorder %s2351_s16, %s2352_s17  ;;  %p2358_p1 = scmp.lt.s32.totalorder %s2356_s25, %s2352_s17 }
 0x3ee   : > { %p2354_p12 = pnand %p2353_p11, %p2497_p5  ;;  %p2359_p2 = por %p2358_p1, %p2357_p0 }
 0x3f0   : > { %p2355_p13 = pneg %p2354_p12 }
 0x3f2   : > { %p2360_p3 = pnand %p2359_p2, %p2355_p13 }
 0x432   : > { %v2899_v13 = vpop.permute.xlu1 %2295  ;;  %v2291_v22 = vpop.permute.xlu2 %2290 }
 0x433   : > { %v2298_v14 = vunpack.i.h.bf16 %v2899_v13  ;;  %v2297_v15 = vunpack.i.l.bf16 %v2899_v13  ;;  %v2293_v23 = vunpack.i.h.bf16 %v2291_v22  ;;  %v2292_v24 = vunpack.i.l.bf16 %v2291_v22  ;;  %v1094_v13 = vld [vmem:[%s3438_s5 + $0xf0] sm:$0xff] }
 0x435   : > { %v1006_v16 = vsel %vm990_vm11, %v2298_v14, 0.0  ;;  %v996_v17 = vsel %vm990_vm11, %v2297_v15, %v2298_v14  ;;  %v991_v6 = vsel %vm990_vm11, %v2292_v24, %v2293_v23  ;;  %v1078_v24 = vld [vmem:[%s3438_s5 + $0x70] sm:$0xff] }
 0x436   : > { %v2907_v18 = vmax.f32 %v965_v42, %v1006_v16  ;;  %v2909_v20 = vmax.f32 %v964_v43, %v996_v17  ;;  %v2940_v39 = vmax.f32 %v958_v58, %v991_v6  ;;  %v1124_v42 = vld [vmem:[%s3438_s5 + $0x1e0] sm:$0xff]  ;;  %v1118_v58 = vld [vmem:[%s3438_s5 + $0x1b0] sm:$0xff]  ;;  %1129 = vmatpush.msrb.mxu0 %v1078_v24 }
 0x437   : > { %1200 = vmatpush.msra.mxu3 %v1124_v42  ;;  %v1092_v6 = vld [vmem:[%s3438_s5 + $0xe0] sm:$0xff] }
 0x438   : > { %v2314_v21 = vpack.i.bf16 %v2907_v18, %v2909_v20  ;;  %v1088_v42 = vld [vmem:[%s3438_s5 + $0xc0] sm:$0xff] }
 0x439   : > { %1201 = vmatpush.msra.mxu3 %v1123_v46  ;;  %v1086_v46 = vld [vmem:[%s3438_s5 + $0xb0] sm:$0xff] }
 0x43a   : > { %2315 = vrot.lane.b32.xlu0 %v2314_v21, %s2406_s28 }
 0x43b   : > { %1202 = vmatpush.msra.mxu3 %v1122_v48  ;;  %v1085_v48 = vld [vmem:[%s3438_s5 + $0xa8] sm:$0xff] }
 0x43d   : > { %1203 = vmatpush.msra.mxu3 %v1121_v52  ;;  %v1084_v52 = vld [vmem:[%s3438_s5 + $0xa0] sm:$0xff] }
 0x43f   : > { %1204 = vmatpush.msra.mxu3 %v1120_v54  ;;  %v1083_v54 = vld [vmem:[%s3438_s5 + $0x98] sm:$0xff] }
 0x441   : > { %1205 = vmatpush.msra.mxu3 %v1119_v56  ;;  %v1082_v56 = vld [vmem:[%s3438_s5 + $0x90] sm:$0xff] }
 0x442   : > { %v2286_v26 = vpop.permute.xlu0 %2285 }
 0x443   : > { %v2288_v10 = vunpack.i.h.bf16 %v2286_v26  ;;  %v2287_v30 = vunpack.i.l.bf16 %v2286_v26  ;;  %1206 = vmatpush.msra.mxu3 %v1118_v58  ;;  %v1093_v26 = vld [vmem:[%s3438_s5 + $0xe8] sm:$0xff] }
 0x444   : > { %v1081_v58 = vld [vmem:[%s3438_s5 + $0x88] sm:$0xff] }
 0x445   : > { %v1005_v34 = vsel %vm990_vm11, %v2288_v10, 0.0  ;;  %v992_v35 = vsel %vm990_vm11, %v2293_v23, %v2287_v30  ;;  %v993_v36 = vsel %vm990_vm11, %v2287_v30, %v2288_v10  ;;  %1207 = vmatpush.msra.mxu3 %v1117_v60  ;;  %v1096_v10 = vld [vmem:[%s3438_s5 + $0x100] sm:$0xff] }
 0x446   : > { %v2936_v37 = vmax.f32 %v961_v50, %v1005_v34  ;;  %v2938_v38 = vmax.f32 %v960_v51, %v993_v36  ;;  %v2942_v40 = vmax.f32 %v959_v59, %v992_v35  ;;  %v1095_v50 = vld [vmem:[%s3438_s5 + $0xf8] sm:$0xff]  ;;  %v1105_v51 = vld [vmem:[%s3438_s5 + $0x148] sm:$0xff]  ;;  %v1112_v30 = vld [vmem:[%s3438_s5 + $0x180] sm:$0xff] }
 0x447   : > { %1151 = vmatpush.msrb.mxu1 %v1095_v50  ;;  %1180 = vmatpush.msra.mxu2 %v1105_v51  ;;  %v1101_v59 = vld [vmem:[%s3438_s5 + $0x128] sm:$0xff]  ;;  %v1090_v34 = vld [vmem:[%s3438_s5 + $0xd0] sm:$0xff]  ;;  %v2085_v50 = vld [vmem:[%s3440_s7 + $0x20] sm:$0xff] }
 0x448   : > { %v2304_v43 = vpack.i.bf16 %v2936_v37, %v2938_v38  ;;  %v2309_v44 = vpack.i.bf16 %v2942_v40, %v2940_v39  ;;  %1208 = vmatpush.msra.mxu3 %v1116_v62  ;;  %v1073_v35 = vld [vmem:[%s3438_s5 + $0x48] sm:$0xff]  ;;  %v1068_v51 = vld [vmem:[%s3438_s5 + $0x20] sm:$0xff] }
 0x449   : > { %1181 = vmatpush.msra.mxu2 %v1104_v53  ;;  %1152 = vmatpush.msrb.mxu1 %v1094_v13  ;;  %v1089_v36 = vld [vmem:[%s3438_s5 + $0xc8] sm:$0xff]  ;;  %v1067_v53 = vld [vmem:[%s3438_s5 + $0x18] sm:$0xff]  ;;  %v1080_v60 = vld [vmem:[%s3438_s5 + $0x80] sm:$0xff] }
 0x44a   : > { %2305 = vrot.lane.b32.xlu2 %v2304_v43, %s2406_s28  ;;  %2310 = vrot.lane.b32.xlu1 %v2309_v44, %s2406_s28  ;;  %v1071_v43 = vld [vmem:[%s3438_s5 + $0x38] sm:$0xff] }
 0x44b   : > { %1182 = vmatpush.msra.mxu2 %v1103_v55  ;;  %1209 = vmatpush.msra.mxu3 %v1115_v3  ;;  %v1087_v44 = vld [vmem:[%s3438_s5 + $0xb8] sm:$0xff]  ;;  %v1066_v55 = vld [vmem:[%s3438_s5 + $0x10] sm:$0xff] }
 0x44c   : > { %1153 = vmatpush.msrb.mxu1 %v1093_v26  ;;  %v744_v26 = vpop.f32.mrf.mxu0 }
 0x44d   : > { %1183 = vmatpush.msra.mxu2 %v1102_v57  ;;  %v1065_v57 = vld [vmem:[%s3438_s5 + $0x8] sm:$0xff] }
 0x44e   : > { %1154 = vmatpush.msrb.mxu1 %v1092_v6 }
 0x44f   : > { %1184 = vmatpush.msra.mxu2 %v1101_v59  ;;  %v1064_v59 = vld [vmem:[%s3438_s5] sm:$0xff] }
 0x450   : > { %1155 = vmatpush.msrb.mxu1 %v1091_v32 }
 0x451   : > { %1185 = vmatpush.msra.mxu2 %v1100_v61 }
 0x452   : > { %1156 = vmatpush.msrb.mxu1 %v1090_v34 }
 0x453   : > { %1186 = vmatpush.msra.mxu2 %v1099_v63 }
 0x454   : > { %1157 = vmatpush.msrb.mxu1 %v1089_v36 }
 0x456   : > { %1158 = vmatpush.msrb.mxu1 %v1088_v42 }
 0x458   : > { %1159 = vmatpush.msrb.mxu1 %v1087_v44 }
 0x45a   : > { %v2301_v7 = vpop.permute.xlu0 %2300  ;;  %1160 = vmatpush.msrb.mxu1 %v1086_v46 }
 0x45b   : > { %v2303_v12 = vunpack.i.h.bf16 %v2301_v7  ;;  %v2302_v14 = vunpack.i.l.bf16 %v2301_v7 }
 0x45c   : > { %1161 = vmatpush.msrb.mxu1 %v1085_v48 }
 0x45d   : > { %v995_v16 = vsel %vm990_vm11, %v2303_v12, %v2297_v15  ;;  %v994_v17 = vsel %vm990_vm11, %v2302_v14, %v2303_v12  ;;  %v1077_v15 = vld [vmem:[%s3438_s5 + $0x68] sm:$0xff] }
 0x45e   : > { %v3021_v21 = vmax.f32 %v2893_v8, %v994_v17  ;;  %v3024_v22 = vmax.f32 %v2895_v11, %v995_v16  ;;  %v1098_v8 = vld [vmem:[%s3438_s5 + $0x110] sm:$0xff]  ;;  %1130 = vmatpush.msrb.mxu0 %v1077_v15  ;;  %1162 = vmatpush.msrb.mxu1 %v1084_v52  ;;  %v2100_v16 = vld [vmem:[%s3440_s7 + $0x48] sm:$0xff]  ;;  %v2099_v17 = vld [vmem:[%s3440_s7 + $0x40] sm:$0xff] }
 0x45f   : > { %v1114_v11 = vld [vmem:[%s3438_s5 + $0x190] sm:$0xff]  ;;  %1187 = vmatpush.msra.mxu2 %v1098_v8  ;;  %v767_v8 = vpop.f32.mrf.mxu1 }
 0x460   : > { %v2319_v23 = vpack.i.bf16 %v3024_v22, %v3021_v21  ;;  %1210 = vmatpush.msra.mxu3 %v1114_v11  ;;  %1131 = vmatpush.msrb.mxu0 %v1076_v1  ;;  %v768_v6 = vadd.f32 %v767_v8, %v744_v26 }
 0x461   : > { %1188 = vmatpush.msra.mxu2 %v1097_v29  ;;  %1163 = vmatpush.msrb.mxu1 %v1083_v54  ;;  %v790_v29 = vpop.f32.mrf.mxu2 }
 0x462   : > { %2320 = vrot.lane.b32.xlu2 %v2319_v23, %s2406_s28  ;;  %1211 = vmatpush.msra.mxu3 %v1113_v9  ;;  %v1221_v23 = vld [vmem:[%s3440_s7 + $0x8] sm:$0xff] }
 0x463   : > { %1189 = vmatpush.msra.mxu2 %v1096_v10  ;;  %1132 = vmatpush.msrb.mxu0 %v1075_v31  ;;  %v791_v10 = vadd.f32 %v790_v29, %v768_v6  ;;  %v1284_v6 = vld [vmem:[%s3441_s8] sm:$0xff] }
 0x464   : > { %1212 = vmatpush.msra.mxu3 %v1112_v30  ;;  %1164 = vmatpush.msrb.mxu1 %v1082_v56  ;;  %v813_v30 = vpop.f32.mrf.mxu3  ;;  %v2101_v56 = vld [vmem:[%s3440_s7 + $0x50] sm:$0xff] }
 0x465   : > { %1133 = vmatpush.msrb.mxu0 %v1074_v33  ;;  %v3163_v31 = vadd.f32 %v813_v30, %v791_v10  ;;  %v747_v33 = vpop.f32.mrf.mxu0  ;;  %v2114_v10 = vld [vmem:[%s3440_s7 + $0x78] sm:$0xff] }
 0x466   : > { %1329 = vmatpush.msrb.mxu3 %v2086_v49  ;;  %1165 = vmatpush.msrb.mxu1 %v1081_v58 }
 0x467   : > { %1134 = vmatpush.msrb.mxu0 %v1073_v35  ;;  %v770_v32 = vpop.f32.mrf.mxu1 }
 0x468   : > { %1330 = vmatpush.msrb.mxu3 %v2085_v50  ;;  %1166 = vmatpush.msrb.mxu1 %v1080_v60  ;;  %v771_v35 = vadd.f32 %v770_v32, %v747_v33  ;;  %v2113_v32 = vld [vmem:[%s3440_s7 + $0x70] sm:$0xff] }
 0x469   : > { %1135 = vmatpush.msrb.mxu0 %v1072_v41  ;;  %v793_v34 = vpop.f32.mrf.mxu2 }
 0x46a   : > { %1275 = vmatpush.msra.mxu1 %v1221_v23  ;;  %v794_v41 = vadd.f32 %v793_v34, %v771_v35  ;;  %v2124_v34 = vld [vmem:[%s3440_s7 + $0x88] sm:$0xff] }
 0x46b   : > { %1136 = vmatpush.msrb.mxu0 %v1071_v43 }
 0x46d   : > { %1137 = vmatpush.msrb.mxu0 %v1070_v45  ;;  %v816_v45 = vpop.f32.mrf.mxu3 }
 0x46e   : > { %v3171_v48 = vadd.f32 %v816_v45, %v794_v41  ;;  %v2123_v41 = vld [vmem:[%s3440_s7 + $0x80] sm:$0xff] }
 0x46f   : > { %1138 = vmatpush.msrb.mxu0 %v1069_v47 }
 0x471   : > { %1139 = vmatpush.msrb.mxu0 %v1068_v51 }
 0x473   : > { %1140 = vmatpush.msrb.mxu0 %v1067_v53 }
 0x475   : > { %1141 = vmatpush.msrb.mxu0 %v1066_v55  ;;  %v2102_v55 = vld [vmem:[%s3440_s7 + $0x58] sm:$0xff] }
 0x477   : > { %1142 = vmatpush.msrb.mxu0 %v1065_v57 }
 0x479   : > { %1143 = vmatpush.msrb.mxu0 %v1064_v59 }
 0x4a4   : > { %v2306_v61 = vpop.permute.xlu2 %2305 }
 0x4a5   : > { %v2308_v62 = vunpack.i.h.bf16 %v2306_v61  ;;  %v2307_v63 = vunpack.i.l.bf16 %v2306_v61 }
 0x4a7   : > { %v1054_v3 = vsel %vm1039_vm12, %v2308_v62, 0.0  ;;  %v1042_v7 = vsel %vm1039_vm12, %v2307_v63, %v2308_v62 }
 0x4a8   : > { %v1059_v12 = vmax.f32 %v2936_v37, %v1054_v3  ;;  %v1058_v14 = vmax.f32 %v2938_v38, %v1042_v7  ;;  %v1220_v37 = vld [vmem:[%s3440_s7] sm:$0xff]  ;;  %v2112_v3 = vld [vmem:[%s3440_s7 + $0x68] sm:$0xff] }
 0x4a9   : > { %1276 = vmatpush.msra.mxu1 %v1220_v37  ;;  %v2111_v7 = vld [vmem:[%s3440_s7 + $0x60] sm:$0xff] }
 0x4aa   : > { %1190 = vmatmul.f32.vlgmr.msra.gmra.mxu2 %v1058_v14  ;;  %1213 = vmatmul.f32.vlgmr.msra.gmra.mxu3 %v1059_v12 }
 0x4ab   : > { %1442 = vmatpush.msra.mxu3 %v2100_v16 }
 0x4ac   : > { %v2316_v38 = vpop.permute.xlu0 %2315 }
 0x4ad   : > { %v2318_v24 = vunpack.i.h.bf16 %v2316_v38  ;;  %v2317_v13 = vunpack.i.l.bf16 %v2316_v38  ;;  %1443 = vmatpush.msra.mxu3 %v2099_v17 }
 0x4af   : > { %v1045_v11 = vsel %vm1039_vm12, %v2317_v13, %v2318_v24  ;;  %v1055_v15 = vsel %vm1039_vm12, %v2318_v24, 0.0 }
 0x4b0   : > { %v1062_v9 = vmax.f32 %v2909_v20, %v1045_v11  ;;  %v1063_v1 = vmax.f32 %v2907_v18, %v1055_v15 }
 0x4b2   : > { %1193 = vmatmul.f32.gmra.mxu2 %v1062_v9  ;;  %1216 = vmatmul.f32.gmra.mxu3 %v1063_v1 }
 0x4ba   : > { %2091 = vmatmul.msk.f32.vlgmr.msrb.gmra.mxu3 %vm1225_vm13, %v3163_v31 }
 0x4bc   : > { %v2311_v36 = vpop.permute.xlu1 %2310  ;;  %v2321_v18 = vpop.permute.xlu2 %2320 }
 0x4bd   : > { %v2313_v20 = vunpack.i.h.bf16 %v2311_v36  ;;  %v2312_v42 = vunpack.i.l.bf16 %v2311_v36  ;;  %v2323_v49 = vunpack.i.h.bf16 %v2321_v18  ;;  %v2322_v50 = vunpack.i.l.bf16 %v2321_v18  ;;  %v2093_v36 = vld [vmem:[%s3441_s8 + $0x10] sm:$0xff] }
 0x4bf   : > { %v1041_v43 = vsel %vm1039_vm12, %v2313_v20, %v2307_v63  ;;  %v1040_v44 = vsel %vm1039_vm12, %v2312_v42, %v2313_v20  ;;  %v1043_v51 = vsel %vm1039_vm12, %v2322_v50, %v2323_v49  ;;  %v1044_v52 = vsel %vm1039_vm12, %v2323_v49, %v2317_v13  ;;  %v1285_v20 = vld [vmem:[%s3441_s8 + $0x8] sm:$0xff]  ;;  %v2107_v49 = vld [vmem:[%s3441_s8 + $0x20] sm:$0xff]  ;;  %v2126_v50 = vld [vmem:[%s3440_s7 + $0x98] sm:$0xff] }
 0x4c0   : > { %v1057_v46 = vmax.f32 %v2942_v40, %v1041_v43  ;;  %v1056_v47 = vmax.f32 %v2940_v39, %v1040_v44  ;;  %v1060_v53 = vmax.f32 %v3021_v21, %v1043_v51  ;;  %v1061_v54 = vmax.f32 %v3024_v22, %v1044_v52  ;;  %v2080_v39 = vld [vmem:[%s3440_s7 + $0x18] sm:$0xff]  ;;  %v2079_v21 = vld [vmem:[%s3440_s7 + $0x10] sm:$0xff]  ;;  %v2136_v52 = vld [vmem:[%s3440_s7 + $0xa8] sm:$0xff] }
 0x4c1   : > { %v2088_v40 = vld [vmem:[%s3440_s7 + $0x38] sm:$0xff]  ;;  %1246 = vmatpush.msra.mxu0 %v2080_v39  ;;  %v2087_v22 = vld [vmem:[%s3440_s7 + $0x30] sm:$0xff] }
 0x4c2   : > { %1144 = vmatmul.f32.vlgmr.msrb.gmra.mxu0 %v1056_v47  ;;  %1167 = vmatmul.f32.vlgmr.msrb.gmra.mxu1 %v1057_v46  ;;  %v2094_v43 = vld [vmem:[%s3441_s8 + $0x18] sm:$0xff]  ;;  %v2125_v51 = vld [vmem:[%s3440_s7 + $0x90] sm:$0xff] }
 0x4c3   : > { %2092 = vmatmul.msk.f32.gmra.mxu3 %vm1225_vm13, %v3171_v48  ;;  %1306 = vmatpush.msrb.mxu2 %v2088_v40 }
 0x4c4   : > { %1247 = vmatpush.msra.mxu0 %v2079_v21 }
 0x4c5   : > { %1307 = vmatpush.msrb.mxu2 %v2087_v22 }
 0x4c7   : > { %1419 = vmatpush.msra.mxu2 %v2102_v55 }
 0x4c9   : > { %1420 = vmatpush.msra.mxu2 %v2101_v56 }
 0x4ca   : > { %1147 = vmatmul.f32.gmra.mxu0 %v1060_v53  ;;  %1170 = vmatmul.f32.gmra.mxu1 %v1061_v54  ;;  %v2135_v53 = vld [vmem:[%s3440_s7 + $0xa0] sm:$0xff]  ;;  %v2108_v54 = vld [vmem:[%s3441_s8 + $0x28] sm:$0xff] }
 0x4cb   : > { %2105 = vmatmul.msk.f32.vlgmr.msra.gmra.mxu3 %vm1225_vm13, %v3163_v31 }
 0x4d2   : > { %2083 = vmatmul.msk.f32.vlgmr.msra.gmra.mxu1 %vm1225_vm13, %v3163_v31 }
 0x4d3   : > { %2106 = vmatmul.msk.f32.gmra.mxu3 %vm1225_vm13, %v3171_v48 }
 0x4da   : > { %2084 = vmatmul.msk.f32.gmra.mxu1 %vm1225_vm13, %v3171_v48 }
 0x52d   : > { %v1191_v57 = vpop.f32.mrf.mxu2  ;;  %v1214_v61 = vpop.f32.mrf.mxu3 }
 0x535   : > { %v1194_v17 = vpop.f32.mrf.mxu2  ;;  %v1217_v37 = vpop.f32.mrf.mxu3 }
 0x53d   : > { %v1332_v13 = vpop.f32.mrf.mxu3 }
 0x53f   : > { %v1145_v58 = vpop.f32.mrf.mxu0  ;;  %v1168_v59 = vpop.f32.mrf.mxu1 }
 0x540   : > { %v1169_v60 = vadd.f32 %v1168_v59, %v1145_v58 }
 0x542   : > { %v1192_v62 = vadd.f32 %v1191_v57, %v1169_v60 }
 0x544   : > { %v3205_v63 = vadd.f32 %v1214_v61, %v1192_v62 }
 0x546   : > { %2081 = vmatmul.msk.f32.vlgmr.msra.gmra.mxu0 %vm1225_vm13, %v3205_v63  ;;  %2089 = vmatmul.msk.f32.vlgmr.msrb.gmra.mxu2 %vm1225_vm13, %v3205_v63  ;;  %v1335_v9 = vpop.f32.mrf.mxu3 }
 0x547   : > { %v1148_v12 = vpop.f32.mrf.mxu0  ;;  %v1171_v14 = vpop.f32.mrf.mxu1  ;;  %1528 = vmatpush.msrb.mxu2 %v2112_v3 }
 0x548   : > { %v1172_v16 = vadd.f32 %v1171_v14, %v1148_v12  ;;  %v2119_v12 = vld [vmem:[%s3441_s8 + $0x30] sm:$0xff]  ;;  %v2138_v14 = vld [vmem:[%s3440_s7 + $0xb8] sm:$0xff] }
 0x549   : > { %1529 = vmatpush.msrb.mxu2 %v2111_v7 }
 0x54a   : > { %v1195_v23 = vadd.f32 %v1194_v17, %v1172_v16  ;;  %v2137_v17 = vld [vmem:[%s3440_s7 + $0xb0] sm:$0xff] }
 0x54c   : > { %v3217_v38 = vadd.f32 %v1217_v37, %v1195_v23  ;;  %v2148_v37 = vld [vmem:[%s3440_s7 + $0xc8] sm:$0xff] }
 0x54e   : > { %2082 = vmatmul.msk.f32.gmra.mxu0 %vm1225_vm13, %v3217_v38  ;;  %2090 = vmatmul.msk.f32.gmra.mxu2 %vm1225_vm13, %v3217_v38  ;;  %v1445_v42 = vpop.f32.mrf.mxu3 }
 0x54f   : > { %v1278_v24 = vpop.f32.mrf.mxu1 }
 0x556   : > { %2103 = vmatmul.msk.f32.vlgmr.msra.gmra.mxu2 %vm1225_vm13, %v3205_v63  ;;  %v1448_v44 = vpop.f32.mrf.mxu3 }
 0x557   : > { %v1281_v15 = vpop.f32.mrf.mxu1 }
 0x55e   : > { %2104 = vmatmul.msk.f32.gmra.mxu2 %vm1225_vm13, %v3217_v38 }
 0x566   : > { %2117 = vmatmul.msk.f32.vlgmr.msrb.gmra.mxu2 %vm1225_vm13, %v3163_v31 }
 0x56e   : > { %2118 = vmatmul.msk.f32.gmra.mxu2 %vm1225_vm13, %v3171_v48 }
 0x5c3   : > { %v1249_v8 = vpop.f32.mrf.mxu0 }
 0x5c4   : > { %v1279_v1 = vadd.f32 %v1278_v24, %v1249_v8  ;;  %v2147_v24 = vld [vmem:[%s3440_s7 + $0xc0] sm:$0xff] }
 0x5c9   : > { %v1309_v11 = vpop.f32.mrf.mxu2 }
 0x5ca   : > { %v1333_v35 = vadd.f32 %v1332_v13, %v1309_v11  ;;  %v2120_v13 = vld [vmem:[%s3441_s8 + $0x38] sm:$0xff] }
 0x5cb   : > { %v1252_v26 = vpop.f32.mrf.mxu0 }
 0x5cc   : > { %v1282_v29 = vadd.f32 %v1281_v15, %v1252_v26 }
 0x5ce   : > { %1390 = vmatpush.msrb.mxu1 %v1282_v29 }
 0x5d0   : > { %1391 = vmatpush.msrb.mxu1 %v1279_v1  ;;  %v2131_v1 = vld [vmem:[%s3441_s8 + $0x40] sm:$0xff] }
 0x5d1   : > { %v1312_v30 = vpop.f32.mrf.mxu2  ;;  %2097 = vmatmul.msk.f32.vlgmr.msrb.gmra.mxu1 %vm1225_vm13, %v1284_v6  ;;  %v2150_v6 = vld [vmem:[%s3440_s7 + $0xd8] sm:$0xff] }
 0x5d2   : > { %v1336_v33 = vadd.f32 %v1335_v9, %v1312_v30  ;;  %1505 = vmatpush.msra.mxu1 %v2114_v10  ;;  %v2149_v10 = vld [vmem:[%s3440_s7 + $0xd0] sm:$0xff]  ;;  %v2132_v30 = vld [vmem:[%s3441_s8 + $0x48] sm:$0xff] }
 0x5d4   : > { %1361 = vmatpush.msrb.mxu0 %v1336_v33  ;;  %1506 = vmatpush.msra.mxu1 %v2113_v32 }
 0x5d6   : > { %1614 = vmatpush.msrb.mxu1 %v2124_v34  ;;  %1362 = vmatpush.msrb.mxu0 %v1333_v35 }
 0x5d7   : > { %2095 = vmatmul.msk.f32.vlgmr.msrb.gmra.mxu0 %vm1225_vm13, %v2093_v36 }
 0x5d8   : > { %1615 = vmatpush.msrb.mxu1 %v2123_v41 }
 0x5d9   : > { %2098 = vmatmul.msk.f32.gmra.mxu1 %vm1225_vm13, %v1285_v20  ;;  %v1422_v18 = vpop.f32.mrf.mxu2 }
 0x5da   : > { %v1446_v47 = vadd.f32 %v1445_v42, %v1422_v18 }
 0x5df   : > { %2096 = vmatmul.msk.f32.gmra.mxu0 %vm1225_vm13, %v2094_v43 }
 0x5e1   : > { %v1425_v45 = vpop.f32.mrf.mxu2  ;;  %2115 = vmatmul.msk.f32.vlgmr.msra.gmra.mxu1 %vm1225_vm13, %v3205_v63 }
 0x5e2   : > { %v1449_v46 = vadd.f32 %v1448_v44, %v1425_v45  ;;  %v2144_v45 = vld [vmem:[%s3441_s8 + $0x58] sm:$0xff] }
 0x5e4   : > { %1474 = vmatpush.msra.mxu0 %v1449_v46 }
 0x5e6   : > { %1475 = vmatpush.msra.mxu0 %v1446_v47 }
 0x5e7   : > { %2109 = vmatmul.msk.f32.vlgmr.msra.gmra.mxu0 %vm1225_vm13, %v2107_v49 }
 0x5e8   : > { %1591 = vmatpush.msrb.mxu0 %v2126_v50 }
 0x5e9   : > { %2116 = vmatmul.msk.f32.gmra.mxu1 %vm1225_vm13, %v3217_v38  ;;  %v1531_v55 = vpop.f32.mrf.mxu2 }
 0x5ea   : > { %1592 = vmatpush.msrb.mxu0 %v2125_v51 }
 0x5ec   : > { %1700 = vmatpush.msra.mxu0 %v2136_v52 }
 0x5ee   : > { %1701 = vmatpush.msra.mxu0 %v2135_v53  ;;  %v2155_v53 = vld [vmem:[%s3441_s8 + $0x60] sm:$0xff] }
 0x5ef   : > { %2110 = vmatmul.msk.f32.gmra.mxu0 %vm1225_vm13, %v2108_v54  ;;  %v2156_v54 = vld [vmem:[%s3441_s8 + $0x68] sm:$0xff] }
 0x5f1   : > { %2129 = vmatmul.msk.f32.vlgmr.msrb.gmra.mxu1 %vm1225_vm13, %v3163_v31  ;;  %v1534_v61 = vpop.f32.mrf.mxu2 }
 0x5f7   : > { %2127 = vmatmul.msk.f32.vlgmr.msrb.gmra.mxu0 %vm1225_vm13, %v3205_v63 }
 0x5f9   : > { %2130 = vmatmul.msk.f32.gmra.mxu1 %vm1225_vm13, %v3171_v48 }
 0x5ff   : > { %2128 = vmatmul.msk.f32.gmra.mxu0 %vm1225_vm13, %v3217_v38 }
 0x607   : > { %2141 = vmatmul.msk.f32.vlgmr.msra.gmra.mxu0 %vm1225_vm13, %v3163_v31 }
 0x60f   : > { %2142 = vmatmul.msk.f32.gmra.mxu0 %vm1225_vm13, %v3171_v48 }
 0x64e   : > { %v1393_v39 = vpop.f32.mrf.mxu1 }
 0x654   : > { %v1364_v40 = vpop.f32.mrf.mxu0 }
 0x655   : > { %v1394_v21 = vadd.f32 %v1393_v39, %v1364_v40  ;;  %v1871_v39 = vld [vmem:[%s3439_s6 + $0x20] sm:$0xff]  ;;  %v1872_v40 = vld [vmem:[%s3439_s6 + $0x28] sm:$0xff] }
 0x656   : > { %v1396_v22 = vpop.f32.mrf.mxu1 }
 0x65c   : > { %v1367_v56 = vpop.f32.mrf.mxu0 }
 0x65d   : > { %v1397_v57 = vadd.f32 %v1396_v22, %v1367_v56  ;;  %v1874_v22 = vld [vmem:[%s3439_s6 + $0x38] sm:$0xff]  ;;  %v1868_v56 = vld [vmem:[%s3439_s6 + $0x8] sm:$0xff] }
 0x65e   : > { %v1508_v58 = vpop.f32.mrf.mxu1 }
 0x65f   : > { %v1532_v7 = vadd.f32 %v1531_v55, %v1508_v58  ;;  %v1867_v55 = vld [vmem:[%s3439_s6] sm:$0xff]  ;;  %v1870_v58 = vld [vmem:[%s3439_s6 + $0x18] sm:$0xff] }
 0x664   : > { %v1477_v59 = vpop.f32.mrf.mxu0 }
 0x665   : > { %v1483_v60 = vadd.f32 %v1477_v59, %v1394_v21  ;;  %v1873_v21 = vld [vmem:[%s3439_s6 + $0x30] sm:$0xff] }
 0x666   : > { %v1511_v62 = vpop.f32.mrf.mxu1 }
 0x667   : > { %v1535_v3 = vadd.f32 %v1534_v61, %v1511_v62 }
 0x669   : > { %1560 = vmatpush.msrb.mxu3 %v1535_v3 }
 0x66b   : > { %1561 = vmatpush.msrb.mxu3 %v1532_v7 }
 0x66c   : > { %v1480_v16 = vpop.f32.mrf.mxu0  ;;  %2121 = vmatmul.msk.f32.vlgmr.msrb.gmra.mxu3 %vm1225_vm13, %v2119_v12 }
 0x66d   : > { %v1484_v23 = vadd.f32 %v1480_v16, %v1397_v57  ;;  %1677 = vmatpush.msra.mxu3 %v2138_v14  ;;  %v1869_v57 = vld [vmem:[%s3439_s6 + $0x10] sm:$0xff] }
 0x66e   : > { %v1617_v8 = vpop.f32.mrf.mxu1 }
 0x66f   : > { %1678 = vmatpush.msra.mxu3 %v2137_v17 }
 0x671   : > { %1786 = vmatpush.msrb.mxu3 %v2148_v37 }
 0x673   : > { %1787 = vmatpush.msrb.mxu3 %v2147_v24 }
 0x674   : > { %2122 = vmatmul.msk.f32.gmra.mxu3 %vm1225_vm13, %v2120_v13  ;;  %v1594_v11 = vpop.f32.mrf.mxu0 }
 0x675   : > { %v1618_v9 = vadd.f32 %v1617_v8, %v1594_v11 }
 0x676   : > { %v1620_v15 = vpop.f32.mrf.mxu1 }
 0x67c   : > { %v1597_v26 = vpop.f32.mrf.mxu0  ;;  %2139 = vmatmul.msk.f32.vlgmr.msra.gmra.mxu3 %vm1225_vm13, %v3205_v63 }
 0x67d   : > { %v1621_v29 = vadd.f32 %v1620_v15, %v1597_v26  ;;  %1941 = vmatpush.msra.mxu3 %v1873_v21 }
 0x67f   : > { %1646 = vmatpush.msra.mxu2 %v1621_v29  ;;  %1942 = vmatpush.msra.mxu3 %v1869_v57 }
 0x681   : > { %1647 = vmatpush.msra.mxu2 %v1618_v9 }
 0x682   : > { %2133 = vmatmul.msk.f32.vlgmr.msra.gmra.mxu2 %vm1225_vm13, %v2131_v1 }
 0x683   : > { %1763 = vmatpush.msrb.mxu2 %v2150_v6 }
 0x684   : > { %2140 = vmatmul.msk.f32.gmra.mxu3 %vm1225_vm13, %v3217_v38  ;;  %v1703_v36 = vpop.f32.mrf.mxu0 }
 0x685   : > { %1764 = vmatpush.msrb.mxu2 %v2149_v10 }
 0x687   : > { %1918 = vmatpush.msra.mxu2 %v1872_v40 }
 0x689   : > { %1919 = vmatpush.msra.mxu2 %v1868_v56 }
 0x68a   : > { %2134 = vmatmul.msk.f32.gmra.mxu2 %vm1225_vm13, %v2132_v30 }
 0x68c   : > { %2153 = vmatmul.msk.f32.vlgmr.msrb.gmra.mxu3 %vm1225_vm13, %v3163_v31  ;;  %v1706_v18 = vpop.f32.mrf.mxu0 }
 0x692   : > { %2151 = vmatmul.msk.f32.vlgmr.msrb.gmra.mxu2 %vm1225_vm13, %v3205_v63 }
 0x694   : > { %2154 = vmatmul.msk.f32.gmra.mxu3 %vm1225_vm13, %v3171_v48  ;;  %v2143_v48 = vld [vmem:[%s3441_s8 + $0x50] sm:$0xff] }
 0x69a   : > { %2152 = vmatmul.msk.f32.gmra.mxu2 %vm1225_vm13, %v3217_v38 }
 0x6ef   : > { %v1563_v32 = vpop.f32.mrf.mxu3 }
 0x6f0   : > { %v1569_v33 = vadd.f32 %v1563_v32, %v1483_v60 }
 0x6f7   : > { %v1566_v34 = vpop.f32.mrf.mxu3 }
 0x6f8   : > { %v1570_v35 = vadd.f32 %v1566_v34, %v1484_v23 }
 0x6ff   : > { %v1680_v41 = vpop.f32.mrf.mxu3 }
 0x700   : > { %v1704_v44 = vadd.f32 %v1703_v36, %v1680_v41 }
 0x705   : > { %v1649_v20 = vpop.f32.mrf.mxu2 }
 0x706   : > { %v1655_v42 = vadd.f32 %v1649_v20, %v1569_v33 }
 0x707   : > { %v1683_v43 = vpop.f32.mrf.mxu3 }
 0x708   : > { %v1707_v31 = vadd.f32 %v1706_v18, %v1683_v43 }
 0x70a   : > { %1732 = vmatpush.msra.mxu1 %v1707_v31 }
 0x70c   : > { %1733 = vmatpush.msra.mxu1 %v1704_v44 }
 0x70d   : > { %v1652_v63 = vpop.f32.mrf.mxu2  ;;  %2145 = vmatmul.msk.f32.vlgmr.msra.gmra.mxu1 %vm1225_vm13, %v2143_v48 }
 0x70e   : > { %v1656_v38 = vadd.f32 %v1652_v63, %v1570_v35  ;;  %1895 = vmatpush.msrb.mxu1 %v1871_v39 }
 0x70f   : > { %v1789_v46 = vpop.f32.mrf.mxu3 }
 0x710   : > { %1896 = vmatpush.msrb.mxu1 %v1867_v55 }
 0x715   : > { %2146 = vmatmul.msk.f32.gmra.mxu1 %vm1225_vm13, %v2144_v45  ;;  %v1766_v47 = vpop.f32.mrf.mxu2 }
 0x716   : > { %v1790_v52 = vadd.f32 %v1789_v46, %v1766_v47 }
 0x717   : > { %v1792_v49 = vpop.f32.mrf.mxu3 }
 0x71d   : > { %v1769_v50 = vpop.f32.mrf.mxu2 }
 0x71e   : > { %v1793_v51 = vadd.f32 %v1792_v49, %v1769_v50 }
 0x720   : > { %1818 = vmatpush.msrb.mxu0 %v1793_v51 }
 0x722   : > { %1819 = vmatpush.msrb.mxu0 %v1790_v52 }
 0x723   : > { %2157 = vmatmul.msk.f32.vlgmr.msrb.gmra.mxu0 %vm1225_vm13, %v2155_v53 }
 0x724   : > { %1964 = vmatpush.msra.mxu0 %v1874_v22 }
 0x726   : > { %1965 = vmatpush.msra.mxu0 %v1870_v58 }
 0x72b   : > { %2158 = vmatmul.msk.f32.gmra.mxu0 %vm1225_vm13, %v2156_v54 }
 0x78a   : > { %v1735_v59 = vpop.f32.mrf.mxu1 }
 0x78b   : > { %v1741_v60 = vadd.f32 %v1735_v59, %v1655_v42 }
 0x792   : > { %v1738_v7 = vpop.f32.mrf.mxu1 }
 0x793   : > { %v1742_v12 = vadd.f32 %v1738_v7, %v1656_v38 }
 0x7a0   : > { %v1821_v61 = vpop.f32.mrf.mxu0 }
 0x7a1   : > { %v1827_v62 = vadd.f32 %v1821_v61, %v1741_v60 }
 0x7a3   : > { %v2159_v3 = vmul.f32 -1.442695, %v1827_v62 }
 0x7a5   : > { %2328 = vpow2.f32 %v2159_v3 }
 0x7a8   : > { %v1824_v14 = vpop.f32.mrf.mxu0 }
 0x7a9   : > { %v1828_v16 = vadd.f32 %v1824_v14, %v1742_v12 }
 0x7ab   : > { %v2329_v17 = vpop.eup %2328  ;;  %v2160_v23 = vmul.f32 -1.442695, %v1828_v16 }
 0x7ac   : > { %v1835_v37 = vadd.f32 1.0, %v2329_v17 }
 0x7ad   : > { %2330 = vpow2.f32 %v2160_v23 }
 0x7ae   : > { %2332 = vrcp.f32 %v1835_v37  ;;  %v1848_v26 = vand.u32 2147483648, %v1835_v37  ;;  %v1846_v9 = vand.u32 2147483647, %v1835_v37  ;;  %vm1842_vm15 = vweird.f32 %v1835_v37 }
 0x7b0   : > { %v1849_v10 = vor.u32 1.1754944e-38, %v1848_v26  ;;  %vm1847_vm1 = vcmp.eq.f32.partialorder %v1846_v9, 8.507059e+37 }
 0x7b3   : > { %v2331_v24 = vpop.eup %2330 }
 0x7b4   : > { %v2333_v13 = vpop.eup %2332  ;;  %v1836_v8 = vadd.f32 1.0, %v2331_v24 }
 0x7b5   : > { %v1838_v11 = vmul.f32 %v2333_v13, %v1835_v37  ;;  %vm1843_vm14 = vweird.f32 %v2333_v13 }
 0x7b6   : > { %2334 = vrcp.f32 %v1836_v8  ;;  %vm1844_vm0 = vmor %vm1842_vm15, %vm1843_vm14  ;;  %v1863_v35 = vand.u32 2147483648, %v1836_v8  ;;  %v1861_v41 = vand.u32 2147483647, %v1836_v8  ;;  %vm1857_vm3 = vweird.f32 %v1836_v8 }
 0x7b7   : > { %v1839_v15 = vsub.f32 1.0, %v1838_v11 }
 0x7b8   : > { %v1864_v42 = vor.u32 1.1754944e-38, %v1863_v35  ;;  %vm1862_vm5 = vcmp.eq.f32.partialorder %v1861_v41, 8.507059e+37 }
 0x7b9   : > { %v1840_v29 = vmul.f32 %v2333_v13, %v1839_v15 }
 0x7bb   : > { %v1841_v1 = vadd.f32 %v2333_v13, %v1840_v29 }
 0x7bc   : > { %v2335_v6 = vpop.eup %2334 }
 0x7bd   : > { %v1845_v30 = vsel %vm1844_vm0, %v2333_v13, %v1841_v1  ;;  %v1853_v32 = vmul.f32 %v2335_v6, %v1836_v8  ;;  %vm1858_vm2 = vweird.f32 %v2335_v6 }
 0x7be   : > { %v1850_v33 = vsel %vm1847_vm1, %v1849_v10, %v1845_v30  ;;  %vm1859_vm4 = vmor %vm1857_vm3, %vm1858_vm2 }
 0x7bf   : > { %2161 = vmatmul.msk.f32.vlgmr.msrb.gmra.mxu1 %vm1225_vm13, %v1850_v33  ;;  %2163 = vmatmul.msk.f32.vlgmr.msra.gmra.mxu2 %vm1225_vm13, %v1850_v33  ;;  %v1854_v34 = vsub.f32 1.0, %v1853_v32 }
 0x7c0   : > { %2165 = vmatmul.msk.f32.vlgmr.msra.gmra.mxu3 %vm1225_vm13, %v1850_v33  ;;  %2167 = vmatmul.msk.f32.vlgmr.msra.gmra.mxu0 %vm1225_vm13, %v1850_v33 }
 0x7c1   : > { %v1855_v36 = vmul.f32 %v2335_v6, %v1854_v34 }
 0x7c3   : > { %v1856_v20 = vadd.f32 %v2335_v6, %v1855_v36 }
 0x7c5   : > { %v1860_v18 = vsel %vm1859_vm4, %v2335_v6, %v1856_v20 }
 0x7c6   : > { %v1865_v43 = vsel %vm1862_vm5, %v1864_v42, %v1860_v18 }
 0x7c7   : > { %2162 = vmatmul.msk.f32.gmra.mxu1 %vm1225_vm13, %v1865_v43  ;;  %2164 = vmatmul.msk.f32.gmra.mxu2 %vm1225_vm13, %v1865_v43 }
 0x7c8   : > { %2166 = vmatmul.msk.f32.gmra.mxu3 %vm1225_vm13, %v1865_v43  ;;  %2168 = vmatmul.msk.f32.gmra.mxu0 %vm1225_vm13, %v1865_v43 }
 0x83c   : > { %v1898_v31 = vpop.f32.mrf.mxu1 }
 0x83d   : > { %v1973_v44 = vmul.f32 %v1898_v31, %v2822_v19  ;;  %v1967_v48 = vpop.f32.mrf.mxu0 }
 0x83e   : > { %v1976_v63 = vmul.f32 %v1967_v48, %v2829_v27 }
 0x83f   : > { %1981 = vst [vmem:[%s325_s24] sm:$0xff] %v1973_v44 }
 0x840   : > { %1984 = vst [vmem:[%s325_s24 + $0x18] sm:$0xff] %v1976_v63 }
 0x842   : > { %v1921_v38 = vpop.f32.mrf.mxu2 }
 0x843   : > { %v1974_v45 = vmul.f32 %v1921_v38, %v2835_v2  ;;  %v1944_v46 = vpop.f32.mrf.mxu3 }
 0x844   : > { %v1975_v47 = vmul.f32 %v1944_v46, %v2826_v25  ;;  %v1901_v49 = vpop.f32.mrf.mxu1 }
 0x845   : > { %1982 = vst [vmem:[%s325_s24 + $0x8] sm:$0xff] %v1974_v45  ;;  %v1977_v50 = vmul.f32 %v1901_v49, %v2832_v28  ;;  %v1970_v51 = vpop.f32.mrf.mxu0 }
 0x846   : > { %1983 = vst [vmem:[%s325_s24 + $0x10] sm:$0xff] %v1975_v47  ;;  %v1980_v19 = vmul.f32 %v1970_v51, %v2847_v4 }
 0x847   : > { %1985 = vst [vmem:[%s325_s24 + $0x20] sm:$0xff] %v1977_v50 }
 0x848   : > { %1988 = vst [vmem:[%s325_s24 + $0x38] sm:$0xff] %v1980_v19 }
 0x84a   : > { %v1924_v27 = vpop.f32.mrf.mxu2 }
 0x84b   : > { %v1978_v25 = vmul.f32 %v1924_v27, %v2850_v5  ;;  %v1947_v2 = vpop.f32.mrf.mxu3 }
 0x84c   : > { %v1979_v28 = vmul.f32 %v1947_v2, %v2844_v0 }
 0x84d   : > { %1986 = vst [vmem:[%s325_s24 + $0x28] sm:$0xff] %v1978_v25 }
 0x84e   : > { %1987 = vst [vmem:[%s325_s24 + $0x30] sm:$0xff] %v1979_v28 }
 0x84f   : > { %2363 = shalt.err (!%p2360_p3)
}
 0x850   : > { %s2407_s22 = smov 512   ;;  %s2408_s24 = smov 32  }
 0x851   : > { %2176 = dma.vmem_to_hbm [thread:$0]  (%p2497_p5), %s2003_s13, 1024, %s2005_s29, %s1990_s14, %s2407_s22, %s2407_s22, %s2408_s24  }
 0x852 PF: > { %p2182_p4 = scmp.ge.s32.totalorder %s2398_s12, 2  ;;  %s2019_s27 = sand.u32 1, %s2386_s30  }
 0x853   : > { %s2020_s21 = scalar_lea.sflag [#allocation3], %s2019_s27 }
 0x854   : > { %p2179_p7 = pnand %p2182_p4, %p2501_p6 }
 0x856   : > { %p2180_p8 = pneg %p2179_p7 }
 0x858   : > { %2381 = dma.done.wait (%p2180_p8), %s2020_s21, 1024  }
 0x859   : > { %2383 = vsyncadd (%p2180_p8), %s2020_s21, 4294966272  ;;  %p19_p9 = scmp.ge.s32.totalorder %s2484_s15, 4   ;;  %s3445_s30 = smov %s2390_s10 }
 0x85a   : > { %s3446_s10 = smov %s2394_s11  ;;  %s3447_s11 = smov %s2495_s18 }
 0x85b   : > { %s3448_s12 = smov %s2484_s15  ;;  %21 = sbr.rel (!%p19_p9) target bundleno = 3 (0x3), region = 110 }
 0x860   :  { %2026 = vsyncpa [#allocation3], 1 }
 0x861   :  { %2028 = vsyncpa [#allocation3 + $0x1], 1 }

</bundles_post_ra>
